<compile_context>
chip_gen: v5e
topology: v5e:2x2
jax: 0.10.0
libtpu: 0.0.40
codegen_flags: <defaults>
</compile_context>

<pallas_src>
import functools

import numpy as np
import jax
import jax.numpy as jnp
from jax.experimental import pallas as pl
from jax.experimental.pallas import tpu as pltpu

EPS = 1e-5  # nn.LayerNorm default eps


# ---------------------------------------------------------------------------
# in-kernel helpers
# ---------------------------------------------------------------------------
def _ln(x, gamma, beta):
    mu = jnp.mean(x, axis=-1, keepdims=True)
    var = jnp.mean(jnp.square(x - mu), axis=-1, keepdims=True)
    return (x - mu) * jax.lax.rsqrt(var + EPS) * gamma + beta


def _gelu_exact(x):
    # nn.GELU() default = exact (erf-based) GELU
    return 0.5 * x * (1.0 + jax.lax.erf(x * (1.0 / jnp.sqrt(2.0))))


def _attention_block(x, y, wq, wkv, bkv, wo, w1, b1, w2, vec, ln2,
                     *, num_heads, causal):
    """PyTorch `Attention.forward(x, y)` on in-register values.

    vec rows: 0 ln1_g, 1 ln1_b, 2 bq (pre-scaled), 3 bo, 4 ln3_g, 5 ln3_b, 6 b2.
    ln2 rows: 0 gamma, 1 beta (over the key/value feature dim c2).
    wq / bq already carry the 1/sqrt(head_dim) attention scale.
    """
    D = x.shape[-1]
    xn = _ln(x, vec[0:1], vec[1:2])
    yn = _ln(y, ln2[0:1], ln2[1:2])

    q = jnp.dot(xn, wq, preferred_element_type=jnp.float32) + vec[2:3]
    kv = jnp.dot(yn, wkv, preferred_element_type=jnp.float32) + bkv     # fused K|V
    k = kv[:, :D]
    v = kv[:, D:]

    Sq = q.shape[0]
    Sk = k.shape[0]
    hd = D // num_heads

    if causal:
        # additive mask built once, reused by every head (no per-head iota/where)
        rows = jax.lax.broadcasted_iota(jnp.int32, (Sq, Sk), 0)
        cols = jax.lax.broadcasted_iota(jnp.int32, (Sq, Sk), 1)
        neg = jnp.where(cols > rows, -jnp.inf, 0.0)          # triu(diagonal=1)

    heads = []
    for h in range(num_heads):      # static unroll (kept for Mosaic-lowering safety)
        qh = q[:, h * hd:(h + 1) * hd]
        kh = k[:, h * hd:(h + 1) * hd]
        vh = v[:, h * hd:(h + 1) * hd]
        s = jnp.dot(qh, kh.T, preferred_element_type=jnp.float32)       # scale folded in wq
        if causal:
            s = s + neg
        s = s - jnp.max(s, axis=-1, keepdims=True)
        p = jnp.exp(s)
        p = p / jnp.sum(p, axis=-1, keepdims=True)
        heads.append(jnp.dot(p, vh, preferred_element_type=jnp.float32))

    attn = jnp.concatenate(heads, axis=-1)
    attn = jnp.dot(attn, wo, preferred_element_type=jnp.float32) + vec[3:4]

    x1 = x + attn                                                       # first residual
    xn3 = _ln(x1, vec[4:5], vec[5:6])
    h1 = _gelu_exact(jnp.dot(xn3, w1, preferred_element_type=jnp.float32) + b1)
    return x1 + jnp.dot(h1, w2, preferred_element_type=jnp.float32) + vec[6:7]


# ---------------------------------------------------------------------------
# Fused whole-forward kernel.  grid = (B, Nlayers); activations carried across the
# layer axis in a VMEM scratch; logits written at the last layer.
# ---------------------------------------------------------------------------
def policy_head_fused_kernel(
        x_emb, e_ref,
        s_wq, s_wkv, s_bkv, s_wo, s_w1, s_b1, s_w2, s_vec, s_ln2,
        c_wq, c_wkv, c_bkv, c_wo, c_w1, c_b1, c_w2, c_vec, c_ln2,
        lf_w, lf_b,
        out_ref, x_sc, *, num_heads):
    layer = pl.program_id(1)

    @pl.when(layer == 0)
    def _():
        x_sc[...] = x_emb[...].astype(jnp.float32)

    x = x_sc[...]

    # ---- PolicyHead.ln1[layer] + causal self-attention Attention block ----
    sv = s_vec[...]            # (9, D): [head_ln_g, head_ln_b, blk ln1_g/b, bq, bo, ln3_g/b, b2]
    xh = _ln(x, sv[0:1], sv[1:2])
    blk = _attention_block(xh, xh,
                           s_wq[...], s_wkv[...], s_bkv[...], s_wo[...],
                           s_w1[...], s_b1[...], s_w2[...],
                           sv[2:], s_ln2[...],
                           num_heads=num_heads, causal=True)
    # TODO(synk): nn.Dropout(p=0.1) is stochastic in training mode; identity here (eval parity).
    x = xh + blk               # in-kernel residual

    # ---- PolicyHead.ln2[layer] + cross-attention Attention block over e ----
    cv = c_vec[...]
    xh = _ln(x, cv[0:1], cv[1:2])
    blk = _attention_block(xh, e_ref[...],
                           c_wq[...], c_wkv[...], c_bkv[...], c_wo[...],
                           c_w1[...], c_b1[...], c_w2[...],
                           cv[2:], c_ln2[...],
                           num_heads=num_heads, causal=False)
    x = xh + blk               # in-kernel residual

    x_sc[...] = x

    @pl.when(layer == pl.num_programs(1) - 1)
    def _():
        # final ReLU + Linear, written as a lane-dense (S, 128) slab
        xr = jnp.maximum(x, 0.0)
        out_ref[...] = (jnp.dot(xr, lf_w[...], preferred_element_type=jnp.float32)
                        + lf_b[...]).astype(out_ref.dtype)


# ---------------------------------------------------------------------------
# Parameter init (deterministic, synthetic) — same structure as the PyTorch module
# ---------------------------------------------------------------------------
def _linear_params(key, din, dout, scale=0.05):
    kw, kb = jax.random.split(key)
    return (jax.random.normal(kw, (din, dout), jnp.float32) * scale,
            jax.random.normal(kb, (1, dout), jnp.float32) * scale)


def _ln_params(key, d):
    kg, kb = jax.random.split(key)
    return (1.0 + 0.1 * jax.random.normal(kg, (1, d), jnp.float32),
            0.1 * jax.random.normal(kb, (1, d), jnp.float32))


def init_attention_params(key, c1, c2, w=4):
    ks = jax.random.split(key, 9)
    ln1_g, ln1_b = _ln_params(ks[0], c1)
    ln2_g, ln2_b = _ln_params(ks[1], c2)
    ln3_g, ln3_b = _ln_params(ks[2], c1)
    wq, bq = _linear_params(ks[3], c1, c1)
    wk, bk = _linear_params(ks[4], c2, c1)
    wv, bv = _linear_params(ks[5], c2, c1)
    wo, bo = _linear_params(ks[6], c1, c1)
    w1, b1 = _linear_params(ks[7], c1, c1 * w)
    w2, b2 = _linear_params(ks[8], c1 * w, c1)
    return dict(ln1_g=ln1_g, ln1_b=ln1_b, ln2_g=ln2_g, ln2_b=ln2_b,
                wq=wq, bq=bq, wk=wk, bk=bk, wv=wv, bv=bv, wo=wo, bo=bo,
                ln3_g=ln3_g, ln3_b=ln3_b, w1=w1, b1=b1, w2=w2, b2=b2)


def init_policy_head_params(key, Nsteps, Nlogits, D, c, Nlayers):
    keys = jax.random.split(key, 3 + Nlayers)
    params = {
        'tok_embedding': 0.1 * jax.random.normal(keys[0], (Nlogits + 1, D), jnp.float32),
        'pos_embedding': 0.1 * jax.random.normal(keys[1], (Nsteps, D), jnp.float32),
        'layers': [],
    }
    lfw, lfb = _linear_params(keys[2], D, Nlogits)
    params['lfinal_w'], params['lfinal_b'] = lfw, lfb
    for i in range(Nlayers):
        lk = jax.random.split(keys[3 + i], 4)
        g1, b1 = _ln_params(lk[0], D)
        g2, b2 = _ln_params(lk[1], D)
        params['layers'].append({
            'ln1_g': g1, 'ln1_b': b1,
            'ln2_g': g2, 'ln2_b': b2,
            'self_attn': init_attention_params(lk[2], D, D),
            'cross_attn': init_attention_params(lk[3], D, c),
        })
    return params


# ---------------------------------------------------------------------------
# Packing: fold attention scale into wq/bq, fuse wk|wv, stack tiny (1,D) params,
# stack per-layer weights with a leading layer dim, zero-pad lfinal to 128 lanes.
# ---------------------------------------------------------------------------
_ATTN_KEYS = ('wq', 'wkv', 'bkv', 'wo', 'w1', 'b1', 'w2', 'vec', 'ln2')


def _pack_attention(p, head_ln_g, head_ln_b, *, num_heads):
    D = p['wq'].shape[0]
    hd = D // num_heads
    scale = 1.0 / float(np.sqrt(hd))
    vec = jnp.concatenate([head_ln_g, head_ln_b,
                           p['ln1_g'], p['ln1_b'],
                           p['bq'] * scale, p['bo'],
                           p['ln3_g'], p['ln3_b'], p['b2']], axis=0)       # (9, D)
    return dict(
        wq=p['wq'] * scale,                                                # scale folded in
        wkv=jnp.concatenate([p['wk'], p['wv']], axis=1),                   # (c2, 2D)
        bkv=jnp.concatenate([p['bk'], p['bv']], axis=1),                   # (1, 2D)
        wo=p['wo'], w1=p['w1'], b1=p['b1'], w2=p['w2'],
        vec=vec,
        ln2=jnp.concatenate([p['ln2_g'], p['ln2_b']], axis=0),             # (2, c2)
    )


def pack_policy_head_params(params, *, num_heads):
    layers = params['layers']
    self_p = [_pack_attention(lp['self_attn'], lp['ln1_g'], lp['ln1_b'],
                              num_heads=num_heads) for lp in layers]
    cross_p = [_pack_attention(lp['cross_attn'], lp['ln2_g'], lp['ln2_b'],
                               num_heads=num_heads) for lp in layers]
    packed = {}
    for k in _ATTN_KEYS:
        packed['s_' + k] = jnp.stack([p[k] for p in self_p], axis=0)
        packed['c_' + k] = jnp.stack([p[k] for p in cross_p], axis=0)

    D = params['tok_embedding'].shape[1]
    Nlogits = params['lfinal_w'].shape[1]
    Npad = ((Nlogits + 127) // 128) * 128                  # lane-dense output width
    packed['lf_w'] = jnp.zeros((D, Npad), jnp.float32).at[:, :Nlogits].set(params['lfinal_w'])
    packed['lf_b'] = jnp.zeros((1, Npad), jnp.float32).at[:, :Nlogits].set(params['lfinal_b'])
    return packed, Npad


# ---------------------------------------------------------------------------
# PolicyHead forward (training branch: forward(e, g=g) -> predict_logits(a, e))
# ---------------------------------------------------------------------------
def policy_head_forward(params, e, g, *, Nheads, Nlayers, start_tok):
    B = g.shape[0]
    # a = concat(START_TOK, g[:, :-1]); embedding gathers stay in plain JAX
    a = jnp.concatenate(
        [jnp.full((B, 1), start_tok, dtype=jnp.int32), g[:, :-1].astype(jnp.int32)],
        axis=1)
    x = params['tok_embedding'][a]                                     # (B, S, D)
    positions = jnp.arange(a.shape[1], dtype=jnp.int32)
    x = x + params['pos_embedding'][positions][None, :, :]

    P, Npad = pack_policy_head_params(params, num_heads=Nheads)
    S, D = x.shape[1], x.shape[2]
    Se, C = e.shape[1], e.shape[2]
    Nlogits = params['lfinal_w'].shape[1]

    def bspec(last2):   # per-batch-element activation
        return pl.BlockSpec((None,) + tuple(last2), lambda b, l: (b, 0, 0))

    def lspec(last2):   # per-layer stacked weights (streamed along the layer axis)
        return pl.BlockSpec((None,) + tuple(last2), lambda b, l: (l, 0, 0))

    def sspec(shape):   # shared (layer-independent) weights, resident
        return pl.BlockSpec(tuple(shape), lambda b, l: (0, 0))

    ins = [x, e]
    specs = [bspec((S, D)), bspec((Se, C))]
    for pre in ('s_', 'c_'):
        for k in _ATTN_KEYS:
            arr = P[pre + k]
            ins.append(arr)
            specs.append(lspec(arr.shape[1:]))
    ins += [P['lf_w'], P['lf_b']]
    specs += [sspec(P['lf_w'].shape), sspec(P['lf_b'].shape)]

    kernel = functools.partial(policy_head_fused_kernel, num_heads=Nheads)
    out = pl.pallas_call(
        kernel,
        out_shape=jax.ShapeDtypeStruct((B, S, Npad), jnp.float32),
        grid=(B, Nlayers),
        in_specs=specs,
        out_specs=pl.BlockSpec((None, S, Npad), lambda b, l: (b, 0, 0)),
        scratch_shapes=[pltpu.VMEM((S, D), jnp.float32)],
        compiler_params=pltpu.CompilerParams(
            dimension_semantics=("parallel", "arbitrary")),
    )(*ins)
    return out[..., :Nlogits]


# ---------------------------------------------------------------------------
# Pure-JAX reference (for numerical validation of the Pallas kernel)
# ---------------------------------------------------------------------------
def _ref_attention_block(x, y, p, *, num_heads, causal):
    xn = _ln(x, p['ln1_g'], p['ln1_b'])
    yn = _ln(y, p['ln2_g'], p['ln2_b'])
    q = xn @ p['wq'] + p['bq']
    k = yn @ p['wk'] + p['bk']
    v = yn @ p['wv'] + p['bv']
    B, Sq, D = q.shape
    Sk = k.shape[1]
    hd = D // num_heads
    qh = q.reshape(B, Sq, num_heads, hd).transpose(0, 2, 1, 3)
    kh = k.reshape(B, Sk, num_heads, hd).transpose(0, 2, 1, 3)
    vh = v.reshape(B, Sk, num_heads, hd).transpose(0, 2, 1, 3)
    s = jnp.einsum('bhqd,bhkd->bhqk', qh, kh) * (1.0 / jnp.sqrt(jnp.float32(hd)))
    if causal:
        mask = jnp.triu(jnp.ones((Sq, Sk), bool), k=1)
        s = jnp.where(mask[None, None], -jnp.inf, s)
    pr = jax.nn.softmax(s, axis=-1)
    o = jnp.einsum('bhqk,bhkd->bhqd', pr, vh).transpose(0, 2, 1, 3).reshape(B, Sq, D)
    attn = o @ p['wo'] + p['bo']
    x = x + attn
    xn3 = _ln(x, p['ln3_g'], p['ln3_b'])
    h = _gelu_exact(xn3 @ p['w1'] + p['b1'])
    return x + h @ p['w2'] + p['b2']


def policy_head_ref(params, e, g, *, Nheads, Nlayers, start_tok):
    B = g.shape[0]
    a = jnp.concatenate(
        [jnp.full((B, 1), start_tok, dtype=jnp.int32), g[:, :-1].astype(jnp.int32)],
        axis=1)
    x = params['tok_embedding'][a]
    x = x + params['pos_embedding'][jnp.arange(a.shape[1])][None, :, :]
    for i in range(Nlayers):
        lp = params['layers'][i]
        x = _ln(x, lp['ln1_g'], lp['ln1_b'])
        x = x + _ref_attention_block(x, x, lp['self_attn'], num_heads=Nheads, causal=True)
        x = _ln(x, lp['ln2_g'], lp['ln2_b'])
        x = x + _ref_attention_block(x, e, lp['cross_attn'], num_heads=Nheads, causal=False)
    return jnp.maximum(x, 0.0) @ params['lfinal_w'] + params['lfinal_b']


# ---------------------------------------------------------------------------
if __name__ == "__main__":
    # Small, forward-consistent shapes
    B = 2
    Nsteps = 8
    elmnt_range = (-1, 1)
    Nlogits = (elmnt_range[1] - elmnt_range[0] + 1) ** 3       # 27
    Nfeatures = 8
    Nheads = 4
    Nlayers = 2
    D = Nfeatures * Nheads                                     # 32
    c = 32                                                     # encoder feature dim
    Se = 16                                                    # encoder seq length

    key = jax.random.PRNGKey(0)
    k_par, k_e, k_g = jax.random.split(key, 3)
    params = init_policy_head_params(k_par, Nsteps, Nlogits, D, c, Nlayers)
    e = jax.random.normal(k_e, (B, Se, c), jnp.float32)        # encoder memory (B, Se, c)
    g = jax.random.randint(k_g, (B, Nsteps), 0, Nlogits)       # ground-truth tokens

    out = policy_head_forward(params, e, g, Nheads=Nheads, Nlayers=Nlayers,
                              start_tok=Nlogits)
    out = jax.block_until_ready(out)
    assert out.shape == (B, Nsteps, Nlogits)

    ref = jax.block_until_ready(
        policy_head_ref(params, e, g, Nheads=Nheads, Nlayers=Nlayers, start_tok=Nlogits))
    np.testing.assert_allclose(np.asarray(out), np.asarray(ref), rtol=2e-3, atol=2e-3)

    print("KERNEL_OK")
</pallas_src>

<mosaic_0001>
module attributes {stable_mosaic.version = 11 : i64} {
  func.func @policy_head_fused_kernel(%arg0: i32, %arg1: i32, %arg2: memref<1x8x32xf32, #tpu.memory_space<vmem>>, %arg3: memref<1x16x32xf32, #tpu.memory_space<vmem>>, %arg4: memref<1x32x32xf32, #tpu.memory_space<vmem>>, %arg5: memref<1x32x64xf32, #tpu.memory_space<vmem>>, %arg6: memref<1x1x64xf32, #tpu.memory_space<vmem>>, %arg7: memref<1x32x32xf32, #tpu.memory_space<vmem>>, %arg8: memref<1x32x128xf32, #tpu.memory_space<vmem>>, %arg9: memref<1x1x128xf32, #tpu.memory_space<vmem>>, %arg10: memref<1x128x32xf32, #tpu.memory_space<vmem>>, %arg11: memref<1x9x32xf32, #tpu.memory_space<vmem>>, %arg12: memref<1x2x32xf32, #tpu.memory_space<vmem>>, %arg13: memref<1x32x32xf32, #tpu.memory_space<vmem>>, %arg14: memref<1x32x64xf32, #tpu.memory_space<vmem>>, %arg15: memref<1x1x64xf32, #tpu.memory_space<vmem>>, %arg16: memref<1x32x32xf32, #tpu.memory_space<vmem>>, %arg17: memref<1x32x128xf32, #tpu.memory_space<vmem>>, %arg18: memref<1x1x128xf32, #tpu.memory_space<vmem>>, %arg19: memref<1x128x32xf32, #tpu.memory_space<vmem>>, %arg20: memref<1x9x32xf32, #tpu.memory_space<vmem>>, %arg21: memref<1x2x32xf32, #tpu.memory_space<vmem>>, %arg22: memref<32x128xf32, #tpu.memory_space<vmem>>, %arg23: memref<1x128xf32, #tpu.memory_space<vmem>>, %arg24: memref<1x8x128xf32, #tpu.memory_space<vmem>>, %arg25: memref<8x32xf32, #tpu.memory_space<vmem>>) attributes {dimension_semantics = [#tpu.dimension_semantics<parallel>, #tpu.dimension_semantics<arbitrary>], iteration_bounds = array<i64: 2, 2>, scalar_prefetch = 0 : i64, scratch_operands = 1 : i64, tpu.core_type = #tpu.core_type<tc>, window_params = [{transform_indices = @transform_0, window_bounds = array<i64: 1, 8, 32>}, {transform_indices = @transform_1, window_bounds = array<i64: 1, 16, 32>}, {transform_indices = @transform_2, window_bounds = array<i64: 1, 32, 32>}, {transform_indices = @transform_3, window_bounds = array<i64: 1, 32, 64>}, {transform_indices = @transform_4, window_bounds = array<i64: 1, 1, 64>}, {transform_indices = @transform_5, window_bounds = array<i64: 1, 32, 32>}, {transform_indices = @transform_6, window_bounds = array<i64: 1, 32, 128>}, {transform_indices = @transform_7, window_bounds = array<i64: 1, 1, 128>}, {transform_indices = @transform_8, window_bounds = array<i64: 1, 128, 32>}, {transform_indices = @transform_9, window_bounds = array<i64: 1, 9, 32>}, {transform_indices = @transform_10, window_bounds = array<i64: 1, 2, 32>}, {transform_indices = @transform_11, window_bounds = array<i64: 1, 32, 32>}, {transform_indices = @transform_12, window_bounds = array<i64: 1, 32, 64>}, {transform_indices = @transform_13, window_bounds = array<i64: 1, 1, 64>}, {transform_indices = @transform_14, window_bounds = array<i64: 1, 32, 32>}, {transform_indices = @transform_15, window_bounds = array<i64: 1, 32, 128>}, {transform_indices = @transform_16, window_bounds = array<i64: 1, 1, 128>}, {transform_indices = @transform_17, window_bounds = array<i64: 1, 128, 32>}, {transform_indices = @transform_18, window_bounds = array<i64: 1, 9, 32>}, {transform_indices = @transform_19, window_bounds = array<i64: 1, 2, 32>}, {pipeline_mode = #tpu.pipeline_mode<synchronous>, transform_indices = @transform_20, window_bounds = array<i64: 32, 128>}, {pipeline_mode = #tpu.pipeline_mode<synchronous>, transform_indices = @transform_21, window_bounds = array<i64: 1, 128>}, {transform_indices = @transform_22, window_bounds = array<i64: 1, 8, 128>}]} {
    %c0_i32 = arith.constant 0 : i32
    %0 = arith.cmpi eq, %arg1, %c0_i32 : i32
    %1 = arith.extui %0 : i1 to i32
    %c0_i32_0 = arith.constant 0 : i32
    %2 = arith.cmpi ne, %1, %c0_i32_0 : i32
    scf.if %2 {
      %c0_153 = arith.constant 0 : index
      %c0_154 = arith.constant 0 : index
      %c0_155 = arith.constant 0 : index
      %438 = vector.load %arg2[%c0_153, %c0_154, %c0_155] : memref<1x8x32xf32, #tpu.memory_space<vmem>>, vector<1x8x32xf32>
      %439 = vector.shape_cast %438 : vector<1x8x32xf32> to vector<8x32xf32>
      %c0_156 = arith.constant 0 : index
      %c0_157 = arith.constant 0 : index
      %440 = vector.load %arg25[%c0_156, %c0_157] : memref<8x32xf32, #tpu.memory_space<vmem>>, vector<8x32xf32>
      tpu.vector_store %arg25[%c0_156, %c0_157], %439 {strides = array<i32>} : memref<8x32xf32, #tpu.memory_space<vmem>>, vector<8x32xf32>,
    } else {
    }
    %c0 = arith.constant 0 : index
    %c0_1 = arith.constant 0 : index
    %3 = vector.load %arg25[%c0, %c0_1] : memref<8x32xf32, #tpu.memory_space<vmem>>, vector<8x32xf32>
    %c0_2 = arith.constant 0 : index
    %c0_3 = arith.constant 0 : index
    %c0_4 = arith.constant 0 : index
    %4 = vector.load %arg11[%c0_2, %c0_3, %c0_4] : memref<1x9x32xf32, #tpu.memory_space<vmem>>, vector<1x9x32xf32>
    %5 = vector.shape_cast %4 : vector<1x9x32xf32> to vector<9x32xf32>
    %6 = vector.extract_strided_slice %5 {offsets = [0, 0], sizes = [1, 32], strides = [1, 1]} : vector<9x32xf32> to vector<1x32xf32>
    %7 = vector.extract_strided_slice %5 {offsets = [1, 0], sizes = [1, 32], strides = [1, 1]} : vector<9x32xf32> to vector<1x32xf32>
    %cst = arith.constant dense<0.000000e+00> : vector<8xf32>
    %8 = vector.multi_reduction <add>, %3, %cst [1] : vector<8x32xf32> to vector<8xf32>
    %9 = vector.shape_cast %8 : vector<8xf32> to vector<8x1xf32>
    %cst_5 = arith.constant 3.200000e+01 : f32
    %10 = vector.broadcast %cst_5 : f32 to vector<8x1xf32>
    %11 = arith.divf %9, %10 : vector<8x1xf32>
    %12 = vector.broadcast %11 : vector<8x1xf32> to vector<8x32xf32>
    %13 = arith.subf %3, %12 : vector<8x32xf32>
    %14 = arith.mulf %13, %13 : vector<8x32xf32>
    %cst_6 = arith.constant dense<0.000000e+00> : vector<8xf32>
    %15 = vector.multi_reduction <add>, %14, %cst_6 [1] : vector<8x32xf32> to vector<8xf32>
    %16 = vector.shape_cast %15 : vector<8xf32> to vector<8x1xf32>
    %cst_7 = arith.constant 3.200000e+01 : f32
    %17 = vector.broadcast %cst_7 : f32 to vector<8x1xf32>
    %18 = arith.divf %16, %17 : vector<8x1xf32>
    %19 = vector.broadcast %11 : vector<8x1xf32> to vector<8x32xf32>
    %20 = arith.subf %3, %19 : vector<8x32xf32>
    %cst_8 = arith.constant 9.99999974E-6 : f32
    %21 = vector.broadcast %cst_8 : f32 to vector<8x1xf32>
    %22 = arith.addf %18, %21 : vector<8x1xf32>
    %23 = math.rsqrt %22 : vector<8x1xf32>
    %24 = vector.broadcast %23 : vector<8x1xf32> to vector<8x32xf32>
    %25 = arith.mulf %20, %24 : vector<8x32xf32>
    %26 = vector.broadcast %6 : vector<1x32xf32> to vector<8x32xf32>
    %27 = arith.mulf %25, %26 : vector<8x32xf32>
    %28 = vector.broadcast %7 : vector<1x32xf32> to vector<8x32xf32>
    %29 = arith.addf %27, %28 : vector<8x32xf32>
    %c0_9 = arith.constant 0 : index
    %c0_10 = arith.constant 0 : index
    %c0_11 = arith.constant 0 : index
    %30 = vector.load %arg4[%c0_9, %c0_10, %c0_11] : memref<1x32x32xf32, #tpu.memory_space<vmem>>, vector<1x32x32xf32>
    %31 = vector.shape_cast %30 : vector<1x32x32xf32> to vector<32x32xf32>
    %c0_12 = arith.constant 0 : index
    %c0_13 = arith.constant 0 : index
    %c0_14 = arith.constant 0 : index
    %32 = vector.load %arg5[%c0_12, %c0_13, %c0_14] : memref<1x32x64xf32, #tpu.memory_space<vmem>>, vector<1x32x64xf32>
    %33 = vector.shape_cast %32 : vector<1x32x64xf32> to vector<32x64xf32>
    %c0_15 = arith.constant 0 : index
    %c0_16 = arith.constant 0 : index
    %c0_17 = arith.constant 0 : index
    %34 = vector.load %arg6[%c0_15, %c0_16, %c0_17] : memref<1x1x64xf32, #tpu.memory_space<vmem>>, vector<1x1x64xf32>
    %35 = vector.shape_cast %34 : vector<1x1x64xf32> to vector<1x64xf32>
    %c0_18 = arith.constant 0 : index
    %c0_19 = arith.constant 0 : index
    %c0_20 = arith.constant 0 : index
    %36 = vector.load %arg7[%c0_18, %c0_19, %c0_20] : memref<1x32x32xf32, #tpu.memory_space<vmem>>, vector<1x32x32xf32>
    %37 = vector.shape_cast %36 : vector<1x32x32xf32> to vector<32x32xf32>
    %c0_21 = arith.constant 0 : index
    %c0_22 = arith.constant 0 : index
    %c0_23 = arith.constant 0 : index
    %38 = vector.load %arg8[%c0_21, %c0_22, %c0_23] : memref<1x32x128xf32, #tpu.memory_space<vmem>>, vector<1x32x128xf32>
    %39 = vector.shape_cast %38 : vector<1x32x128xf32> to vector<32x128xf32>
    %c0_24 = arith.constant 0 : index
    %c0_25 = arith.constant 0 : index
    %c0_26 = arith.constant 0 : index
    %40 = vector.load %arg9[%c0_24, %c0_25, %c0_26] : memref<1x1x128xf32, #tpu.memory_space<vmem>>, vector<1x1x128xf32>
    %41 = vector.shape_cast %40 : vector<1x1x128xf32> to vector<1x128xf32>
    %c0_27 = arith.constant 0 : index
    %c0_28 = arith.constant 0 : index
    %c0_29 = arith.constant 0 : index
    %42 = vector.load %arg10[%c0_27, %c0_28, %c0_29] : memref<1x128x32xf32, #tpu.memory_space<vmem>>, vector<1x128x32xf32>
    %43 = vector.shape_cast %42 : vector<1x128x32xf32> to vector<128x32xf32>
    %44 = vector.extract_strided_slice %5 {offsets = [2, 0], sizes = [7, 32], strides = [1, 1]} : vector<9x32xf32> to vector<7x32xf32>
    %c0_30 = arith.constant 0 : index
    %c0_31 = arith.constant 0 : index
    %c0_32 = arith.constant 0 : index
    %45 = vector.load %arg12[%c0_30, %c0_31, %c0_32] : memref<1x2x32xf32, #tpu.memory_space<vmem>>, vector<1x2x32xf32>
    %46 = vector.shape_cast %45 : vector<1x2x32xf32> to vector<2x32xf32>
    %47 = vector.extract_strided_slice %44 {offsets = [0, 0], sizes = [1, 32], strides = [1, 1]} : vector<7x32xf32> to vector<1x32xf32>
    %48 = vector.extract_strided_slice %44 {offsets = [1, 0], sizes = [1, 32], strides = [1, 1]} : vector<7x32xf32> to vector<1x32xf32>
    %cst_33 = arith.constant dense<0.000000e+00> : vector<8xf32>
    %49 = vector.multi_reduction <add>, %29, %cst_33 [1] : vector<8x32xf32> to vector<8xf32>
    %50 = vector.shape_cast %49 : vector<8xf32> to vector<8x1xf32>
    %cst_34 = arith.constant 3.200000e+01 : f32
    %51 = vector.broadcast %cst_34 : f32 to vector<8x1xf32>
    %52 = arith.divf %50, %51 : vector<8x1xf32>
    %53 = vector.broadcast %52 : vector<8x1xf32> to vector<8x32xf32>
    %54 = arith.subf %29, %53 : vector<8x32xf32>
    %55 = arith.mulf %54, %54 : vector<8x32xf32>
    %cst_35 = arith.constant dense<0.000000e+00> : vector<8xf32>
    %56 = vector.multi_reduction <add>, %55, %cst_35 [1] : vector<8x32xf32> to vector<8xf32>
    %57 = vector.shape_cast %56 : vector<8xf32> to vector<8x1xf32>
    %cst_36 = arith.constant 3.200000e+01 : f32
    %58 = vector.broadcast %cst_36 : f32 to vector<8x1xf32>
    %59 = arith.divf %57, %58 : vector<8x1xf32>
    %60 = vector.broadcast %52 : vector<8x1xf32> to vector<8x32xf32>
    %61 = arith.subf %29, %60 : vector<8x32xf32>
    %cst_37 = arith.constant 9.99999974E-6 : f32
    %62 = vector.broadcast %cst_37 : f32 to vector<8x1xf32>
    %63 = arith.addf %59, %62 : vector<8x1xf32>
    %64 = math.rsqrt %63 : vector<8x1xf32>
    %65 = vector.broadcast %64 : vector<8x1xf32> to vector<8x32xf32>
    %66 = arith.mulf %61, %65 : vector<8x32xf32>
    %67 = vector.broadcast %47 : vector<1x32xf32> to vector<8x32xf32>
    %68 = arith.mulf %66, %67 : vector<8x32xf32>
    %69 = vector.broadcast %48 : vector<1x32xf32> to vector<8x32xf32>
    %70 = arith.addf %68, %69 : vector<8x32xf32>
    %71 = vector.extract_strided_slice %46 {offsets = [0, 0], sizes = [1, 32], strides = [1, 1]} : vector<2x32xf32> to vector<1x32xf32>
    %72 = vector.extract_strided_slice %46 {offsets = [1, 0], sizes = [1, 32], strides = [1, 1]} : vector<2x32xf32> to vector<1x32xf32>
    %cst_38 = arith.constant dense<0.000000e+00> : vector<8xf32>
    %73 = vector.multi_reduction <add>, %29, %cst_38 [1] : vector<8x32xf32> to vector<8xf32>
    %74 = vector.shape_cast %73 : vector<8xf32> to vector<8x1xf32>
    %cst_39 = arith.constant 3.200000e+01 : f32
    %75 = vector.broadcast %cst_39 : f32 to vector<8x1xf32>
    %76 = arith.divf %74, %75 : vector<8x1xf32>
    %77 = vector.broadcast %76 : vector<8x1xf32> to vector<8x32xf32>
    %78 = arith.subf %29, %77 : vector<8x32xf32>
    %79 = arith.mulf %78, %78 : vector<8x32xf32>
    %cst_40 = arith.constant dense<0.000000e+00> : vector<8xf32>
    %80 = vector.multi_reduction <add>, %79, %cst_40 [1] : vector<8x32xf32> to vector<8xf32>
    %81 = vector.shape_cast %80 : vector<8xf32> to vector<8x1xf32>
    %cst_41 = arith.constant 3.200000e+01 : f32
    %82 = vector.broadcast %cst_41 : f32 to vector<8x1xf32>
    %83 = arith.divf %81, %82 : vector<8x1xf32>
    %84 = vector.broadcast %76 : vector<8x1xf32> to vector<8x32xf32>
    %85 = arith.subf %29, %84 : vector<8x32xf32>
    %cst_42 = arith.constant 9.99999974E-6 : f32
    %86 = vector.broadcast %cst_42 : f32 to vector<8x1xf32>
    %87 = arith.addf %83, %86 : vector<8x1xf32>
    %88 = math.rsqrt %87 : vector<8x1xf32>
    %89 = vector.broadcast %88 : vector<8x1xf32> to vector<8x32xf32>
    %90 = arith.mulf %85, %89 : vector<8x32xf32>
    %91 = vector.broadcast %71 : vector<1x32xf32> to vector<8x32xf32>
    %92 = arith.mulf %90, %91 : vector<8x32xf32>
    %93 = vector.broadcast %72 : vector<1x32xf32> to vector<8x32xf32>
    %94 = arith.addf %92, %93 : vector<8x32xf32>
    %cst_43 = arith.constant dense<0.000000e+00> : vector<8x32xf32>
    %95 = tpu.matmul %70, %31, %cst_43 {dimension_numbers = #tpu.dot_dimension_numbers<[1], [0], [0], [1], [0, 0, 1, 1], [], []>} : vector<8x32xf32>, vector<32x32xf32>, vector<8x32xf32> -> vector<8x32xf32>
    %96 = vector.extract_strided_slice %44 {offsets = [2, 0], sizes = [1, 32], strides = [1, 1]} : vector<7x32xf32> to vector<1x32xf32>
    %97 = vector.broadcast %96 : vector<1x32xf32> to vector<8x32xf32>
    %98 = arith.addf %95, %97 : vector<8x32xf32>
    %cst_44 = arith.constant dense<0.000000e+00> : vector<8x64xf32>
    %99 = tpu.matmul %94, %33, %cst_44 {dimension_numbers = #tpu.dot_dimension_numbers<[1], [0], [0], [1], [0, 0, 1, 1], [], []>} : vector<8x32xf32>, vector<32x64xf32>, vector<8x64xf32> -> vector<8x64xf32>
    %100 = vector.broadcast %35 : vector<1x64xf32> to vector<8x64xf32>
    %101 = arith.addf %99, %100 : vector<8x64xf32>
    %102 = vector.extract_strided_slice %101 {offsets = [0, 0], sizes = [8, 32], strides = [1, 1]} : vector<8x64xf32> to vector<8x32xf32>
    %103 = vector.extract_strided_slice %101 {offsets = [0, 32], sizes = [8, 32], strides = [1, 1]} : vector<8x64xf32> to vector<8x32xf32>
    %104 = tpu.iota {dimensions = array<i32: 0>} : vector<8x8xi32>
    %105 = tpu.iota {dimensions = array<i32: 1>} : vector<8x8xi32>
    %106 = arith.cmpi sgt, %105, %104 : vector<8x8xi32>
    %cst_45 = arith.constant 0xFF800000 : f32
    %cst_46 = arith.constant 0.000000e+00 : f32
    %107 = vector.broadcast %cst_45 : f32 to vector<8x8xf32>
    %108 = vector.broadcast %cst_46 : f32 to vector<8x8xf32>
    %109 = arith.select %106, %107, %108 : vector<8x8xi1>, vector<8x8xf32>
    %110 = vector.extract_strided_slice %98 {offsets = [0, 0], sizes = [8, 8], strides = [1, 1]} : vector<8x32xf32> to vector<8x8xf32>
    %111 = vector.extract_strided_slice %102 {offsets = [0, 0], sizes = [8, 8], strides = [1, 1]} : vector<8x32xf32> to vector<8x8xf32>
    %112 = vector.extract_strided_slice %103 {offsets = [0, 0], sizes = [8, 8], strides = [1, 1]} : vector<8x32xf32> to vector<8x8xf32>
    %113 = tpu.transpose %111, [1, 0] : vector<8x8xf32> -> vector<8x8xf32>
    %cst_47 = arith.constant dense<0.000000e+00> : vector<8x8xf32>
    %114 = tpu.matmul %110, %113, %cst_47 {dimension_numbers = #tpu.dot_dimension_numbers<[1], [0], [0], [1], [0, 0, 1, 1], [], []>} : vector<8x8xf32>, vector<8x8xf32>, vector<8x8xf32> -> vector<8x8xf32>
    %115 = arith.addf %114, %109 : vector<8x8xf32>
    %cst_48 = arith.constant dense<0xFF800000> : vector<8xf32>
    %116 = vector.multi_reduction <maximumf>, %115, %cst_48 [1] : vector<8x8xf32> to vector<8xf32>
    %117 = vector.shape_cast %116 : vector<8xf32> to vector<8x1xf32>
    %118 = vector.broadcast %117 : vector<8x1xf32> to vector<8x8xf32>
    %119 = arith.subf %115, %118 : vector<8x8xf32>
    %120 = math.exp %119 : vector<8x8xf32>
    %cst_49 = arith.constant dense<0.000000e+00> : vector<8xf32>
    %121 = vector.multi_reduction <add>, %120, %cst_49 [1] : vector<8x8xf32> to vector<8xf32>
    %122 = vector.shape_cast %121 : vector<8xf32> to vector<8x1xf32>
    %123 = vector.broadcast %122 : vector<8x1xf32> to vector<8x8xf32>
    %124 = arith.divf %120, %123 : vector<8x8xf32>
    %cst_50 = arith.constant dense<0.000000e+00> : vector<8x8xf32>
    %125 = tpu.matmul %124, %112, %cst_50 {dimension_numbers = #tpu.dot_dimension_numbers<[1], [0], [0], [1], [0, 0, 1, 1], [], []>} : vector<8x8xf32>, vector<8x8xf32>, vector<8x8xf32> -> vector<8x8xf32>
    %126 = vector.extract_strided_slice %98 {offsets = [0, 8], sizes = [8, 8], strides = [1, 1]} : vector<8x32xf32> to vector<8x8xf32>
    %127 = vector.extract_strided_slice %102 {offsets = [0, 8], sizes = [8, 8], strides = [1, 1]} : vector<8x32xf32> to vector<8x8xf32>
    %128 = vector.extract_strided_slice %103 {offsets = [0, 8], sizes = [8, 8], strides = [1, 1]} : vector<8x32xf32> to vector<8x8xf32>
    %129 = tpu.transpose %127, [1, 0] : vector<8x8xf32> -> vector<8x8xf32>
    %cst_51 = arith.constant dense<0.000000e+00> : vector<8x8xf32>
    %130 = tpu.matmul %126, %129, %cst_51 {dimension_numbers = #tpu.dot_dimension_numbers<[1], [0], [0], [1], [0, 0, 1, 1], [], []>} : vector<8x8xf32>, vector<8x8xf32>, vector<8x8xf32> -> vector<8x8xf32>
    %131 = arith.addf %130, %109 : vector<8x8xf32>
    %cst_52 = arith.constant dense<0xFF800000> : vector<8xf32>
    %132 = vector.multi_reduction <maximumf>, %131, %cst_52 [1] : vector<8x8xf32> to vector<8xf32>
    %133 = vector.shape_cast %132 : vector<8xf32> to vector<8x1xf32>
    %134 = vector.broadcast %133 : vector<8x1xf32> to vector<8x8xf32>
    %135 = arith.subf %131, %134 : vector<8x8xf32>
    %136 = math.exp %135 : vector<8x8xf32>
    %cst_53 = arith.constant dense<0.000000e+00> : vector<8xf32>
    %137 = vector.multi_reduction <add>, %136, %cst_53 [1] : vector<8x8xf32> to vector<8xf32>
    %138 = vector.shape_cast %137 : vector<8xf32> to vector<8x1xf32>
    %139 = vector.broadcast %138 : vector<8x1xf32> to vector<8x8xf32>
    %140 = arith.divf %136, %139 : vector<8x8xf32>
    %cst_54 = arith.constant dense<0.000000e+00> : vector<8x8xf32>
    %141 = tpu.matmul %140, %128, %cst_54 {dimension_numbers = #tpu.dot_dimension_numbers<[1], [0], [0], [1], [0, 0, 1, 1], [], []>} : vector<8x8xf32>, vector<8x8xf32>, vector<8x8xf32> -> vector<8x8xf32>
    %142 = vector.extract_strided_slice %98 {offsets = [0, 16], sizes = [8, 8], strides = [1, 1]} : vector<8x32xf32> to vector<8x8xf32>
    %143 = vector.extract_strided_slice %102 {offsets = [0, 16], sizes = [8, 8], strides = [1, 1]} : vector<8x32xf32> to vector<8x8xf32>
    %144 = vector.extract_strided_slice %103 {offsets = [0, 16], sizes = [8, 8], strides = [1, 1]} : vector<8x32xf32> to vector<8x8xf32>
    %145 = tpu.transpose %143, [1, 0] : vector<8x8xf32> -> vector<8x8xf32>
    %cst_55 = arith.constant dense<0.000000e+00> : vector<8x8xf32>
    %146 = tpu.matmul %142, %145, %cst_55 {dimension_numbers = #tpu.dot_dimension_numbers<[1], [0], [0], [1], [0, 0, 1, 1], [], []>} : vector<8x8xf32>, vector<8x8xf32>, vector<8x8xf32> -> vector<8x8xf32>
    %147 = arith.addf %146, %109 : vector<8x8xf32>
    %cst_56 = arith.constant dense<0xFF800000> : vector<8xf32>
    %148 = vector.multi_reduction <maximumf>, %147, %cst_56 [1] : vector<8x8xf32> to vector<8xf32>
    %149 = vector.shape_cast %148 : vector<8xf32> to vector<8x1xf32>
    %150 = vector.broadcast %149 : vector<8x1xf32> to vector<8x8xf32>
    %151 = arith.subf %147, %150 : vector<8x8xf32>
    %152 = math.exp %151 : vector<8x8xf32>
    %cst_57 = arith.constant dense<0.000000e+00> : vector<8xf32>
    %153 = vector.multi_reduction <add>, %152, %cst_57 [1] : vector<8x8xf32> to vector<8xf32>
    %154 = vector.shape_cast %153 : vector<8xf32> to vector<8x1xf32>
    %155 = vector.broadcast %154 : vector<8x1xf32> to vector<8x8xf32>
    %156 = arith.divf %152, %155 : vector<8x8xf32>
    %cst_58 = arith.constant dense<0.000000e+00> : vector<8x8xf32>
    %157 = tpu.matmul %156, %144, %cst_58 {dimension_numbers = #tpu.dot_dimension_numbers<[1], [0], [0], [1], [0, 0, 1, 1], [], []>} : vector<8x8xf32>, vector<8x8xf32>, vector<8x8xf32> -> vector<8x8xf32>
    %158 = vector.extract_strided_slice %98 {offsets = [0, 24], sizes = [8, 8], strides = [1, 1]} : vector<8x32xf32> to vector<8x8xf32>
    %159 = vector.extract_strided_slice %102 {offsets = [0, 24], sizes = [8, 8], strides = [1, 1]} : vector<8x32xf32> to vector<8x8xf32>
    %160 = vector.extract_strided_slice %103 {offsets = [0, 24], sizes = [8, 8], strides = [1, 1]} : vector<8x32xf32> to vector<8x8xf32>
    %161 = tpu.transpose %159, [1, 0] : vector<8x8xf32> -> vector<8x8xf32>
    %cst_59 = arith.constant dense<0.000000e+00> : vector<8x8xf32>
    %162 = tpu.matmul %158, %161, %cst_59 {dimension_numbers = #tpu.dot_dimension_numbers<[1], [0], [0], [1], [0, 0, 1, 1], [], []>} : vector<8x8xf32>, vector<8x8xf32>, vector<8x8xf32> -> vector<8x8xf32>
    %163 = arith.addf %162, %109 : vector<8x8xf32>
    %cst_60 = arith.constant dense<0xFF800000> : vector<8xf32>
    %164 = vector.multi_reduction <maximumf>, %163, %cst_60 [1] : vector<8x8xf32> to vector<8xf32>
    %165 = vector.shape_cast %164 : vector<8xf32> to vector<8x1xf32>
    %166 = vector.broadcast %165 : vector<8x1xf32> to vector<8x8xf32>
    %167 = arith.subf %163, %166 : vector<8x8xf32>
    %168 = math.exp %167 : vector<8x8xf32>
    %cst_61 = arith.constant dense<0.000000e+00> : vector<8xf32>
    %169 = vector.multi_reduction <add>, %168, %cst_61 [1] : vector<8x8xf32> to vector<8xf32>
    %170 = vector.shape_cast %169 : vector<8xf32> to vector<8x1xf32>
    %171 = vector.broadcast %170 : vector<8x1xf32> to vector<8x8xf32>
    %172 = arith.divf %168, %171 : vector<8x8xf32>
    %cst_62 = arith.constant dense<0.000000e+00> : vector<8x8xf32>
    %173 = tpu.matmul %172, %160, %cst_62 {dimension_numbers = #tpu.dot_dimension_numbers<[1], [0], [0], [1], [0, 0, 1, 1], [], []>} : vector<8x8xf32>, vector<8x8xf32>, vector<8x8xf32> -> vector<8x8xf32>
    %174 = tpu.concatenate %125, %141, %157, %173 in 1 : vector<8x8xf32>, vector<8x8xf32>, vector<8x8xf32>, vector<8x8xf32> -> vector<8x32xf32>
    %cst_63 = arith.constant dense<0.000000e+00> : vector<8x32xf32>
    %175 = tpu.matmul %174, %37, %cst_63 {dimension_numbers = #tpu.dot_dimension_numbers<[1], [0], [0], [1], [0, 0, 1, 1], [], []>} : vector<8x32xf32>, vector<32x32xf32>, vector<8x32xf32> -> vector<8x32xf32>
    %176 = vector.extract_strided_slice %44 {offsets = [3, 0], sizes = [1, 32], strides = [1, 1]} : vector<7x32xf32> to vector<1x32xf32>
    %177 = vector.broadcast %176 : vector<1x32xf32> to vector<8x32xf32>
    %178 = arith.addf %175, %177 : vector<8x32xf32>
    %179 = arith.addf %29, %178 : vector<8x32xf32>
    %180 = vector.extract_strided_slice %44 {offsets = [4, 0], sizes = [1, 32], strides = [1, 1]} : vector<7x32xf32> to vector<1x32xf32>
    %181 = vector.extract_strided_slice %44 {offsets = [5, 0], sizes = [1, 32], strides = [1, 1]} : vector<7x32xf32> to vector<1x32xf32>
    %cst_64 = arith.constant dense<0.000000e+00> : vector<8xf32>
    %182 = vector.multi_reduction <add>, %179, %cst_64 [1] : vector<8x32xf32> to vector<8xf32>
    %183 = vector.shape_cast %182 : vector<8xf32> to vector<8x1xf32>
    %cst_65 = arith.constant 3.200000e+01 : f32
    %184 = vector.broadcast %cst_65 : f32 to vector<8x1xf32>
    %185 = arith.divf %183, %184 : vector<8x1xf32>
    %186 = vector.broadcast %185 : vector<8x1xf32> to vector<8x32xf32>
    %187 = arith.subf %179, %186 : vector<8x32xf32>
    %188 = arith.mulf %187, %187 : vector<8x32xf32>
    %cst_66 = arith.constant dense<0.000000e+00> : vector<8xf32>
    %189 = vector.multi_reduction <add>, %188, %cst_66 [1] : vector<8x32xf32> to vector<8xf32>
    %190 = vector.shape_cast %189 : vector<8xf32> to vector<8x1xf32>
    %cst_67 = arith.constant 3.200000e+01 : f32
    %191 = vector.broadcast %cst_67 : f32 to vector<8x1xf32>
    %192 = arith.divf %190, %191 : vector<8x1xf32>
    %193 = vector.broadcast %185 : vector<8x1xf32> to vector<8x32xf32>
    %194 = arith.subf %179, %193 : vector<8x32xf32>
    %cst_68 = arith.constant 9.99999974E-6 : f32
    %195 = vector.broadcast %cst_68 : f32 to vector<8x1xf32>
    %196 = arith.addf %192, %195 : vector<8x1xf32>
    %197 = math.rsqrt %196 : vector<8x1xf32>
    %198 = vector.broadcast %197 : vector<8x1xf32> to vector<8x32xf32>
    %199 = arith.mulf %194, %198 : vector<8x32xf32>
    %200 = vector.broadcast %180 : vector<1x32xf32> to vector<8x32xf32>
    %201 = arith.mulf %199, %200 : vector<8x32xf32>
    %202 = vector.broadcast %181 : vector<1x32xf32> to vector<8x32xf32>
    %203 = arith.addf %201, %202 : vector<8x32xf32>
    %cst_69 = arith.constant dense<0.000000e+00> : vector<8x128xf32>
    %204 = tpu.matmul %203, %39, %cst_69 {dimension_numbers = #tpu.dot_dimension_numbers<[1], [0], [0], [1], [0, 0, 1, 1], [], []>} : vector<8x32xf32>, vector<32x128xf32>, vector<8x128xf32> -> vector<8x128xf32>
    %205 = vector.broadcast %41 : vector<1x128xf32> to vector<8x128xf32>
    %206 = arith.addf %204, %205 : vector<8x128xf32>
    %cst_70 = arith.constant 5.000000e-01 : f32
    %207 = vector.broadcast %cst_70 : f32 to vector<8x128xf32>
    %208 = arith.mulf %207, %206 : vector<8x128xf32>
    %cst_71 = arith.constant 2.000000e+00 : f32
    %209 = math.sqrt %cst_71 : f32
    %cst_72 = arith.constant 1.000000e+00 : f32
    %210 = arith.divf %cst_72, %209 : f32
    %211 = vector.broadcast %210 : f32 to vector<8x128xf32>
    %212 = arith.mulf %206, %211 : vector<8x128xf32>
    %213 = math.erf %212 : vector<8x128xf32>
    %cst_73 = arith.constant 1.000000e+00 : f32
    %214 = vector.broadcast %cst_73 : f32 to vector<8x128xf32>
    %215 = arith.addf %214, %213 : vector<8x128xf32>
    %216 = arith.mulf %208, %215 : vector<8x128xf32>
    %cst_74 = arith.constant dense<0.000000e+00> : vector<8x32xf32>
    %217 = tpu.matmul %216, %43, %cst_74 {dimension_numbers = #tpu.dot_dimension_numbers<[1], [0], [0], [1], [0, 0, 1, 1], [], []>} : vector<8x128xf32>, vector<128x32xf32>, vector<8x32xf32> -> vector<8x32xf32>
    %218 = arith.addf %179, %217 : vector<8x32xf32>
    %219 = vector.extract_strided_slice %44 {offsets = [6, 0], sizes = [1, 32], strides = [1, 1]} : vector<7x32xf32> to vector<1x32xf32>
    %220 = vector.broadcast %219 : vector<1x32xf32> to vector<8x32xf32>
    %221 = arith.addf %218, %220 : vector<8x32xf32>
    %222 = arith.addf %29, %221 : vector<8x32xf32>
    %c0_75 = arith.constant 0 : index
    %c0_76 = arith.constant 0 : index
    %c0_77 = arith.constant 0 : index
    %223 = vector.load %arg20[%c0_75, %c0_76, %c0_77] : memref<1x9x32xf32, #tpu.memory_space<vmem>>, vector<1x9x32xf32>
    %224 = vector.shape_cast %223 : vector<1x9x32xf32> to vector<9x32xf32>
    %225 = vector.extract_strided_slice %224 {offsets = [0, 0], sizes = [1, 32], strides = [1, 1]} : vector<9x32xf32> to vector<1x32xf32>
    %226 = vector.extract_strided_slice %224 {offsets = [1, 0], sizes = [1, 32], strides = [1, 1]} : vector<9x32xf32> to vector<1x32xf32>
    %cst_78 = arith.constant dense<0.000000e+00> : vector<8xf32>
    %227 = vector.multi_reduction <add>, %222, %cst_78 [1] : vector<8x32xf32> to vector<8xf32>
    %228 = vector.shape_cast %227 : vector<8xf32> to vector<8x1xf32>
    %cst_79 = arith.constant 3.200000e+01 : f32
    %229 = vector.broadcast %cst_79 : f32 to vector<8x1xf32>
    %230 = arith.divf %228, %229 : vector<8x1xf32>
    %231 = vector.broadcast %230 : vector<8x1xf32> to vector<8x32xf32>
    %232 = arith.subf %222, %231 : vector<8x32xf32>
    %233 = arith.mulf %232, %232 : vector<8x32xf32>
    %cst_80 = arith.constant dense<0.000000e+00> : vector<8xf32>
    %234 = vector.multi_reduction <add>, %233, %cst_80 [1] : vector<8x32xf32> to vector<8xf32>
    %235 = vector.shape_cast %234 : vector<8xf32> to vector<8x1xf32>
    %cst_81 = arith.constant 3.200000e+01 : f32
    %236 = vector.broadcast %cst_81 : f32 to vector<8x1xf32>
    %237 = arith.divf %235, %236 : vector<8x1xf32>
    %238 = vector.broadcast %230 : vector<8x1xf32> to vector<8x32xf32>
    %239 = arith.subf %222, %238 : vector<8x32xf32>
    %cst_82 = arith.constant 9.99999974E-6 : f32
    %240 = vector.broadcast %cst_82 : f32 to vector<8x1xf32>
    %241 = arith.addf %237, %240 : vector<8x1xf32>
    %242 = math.rsqrt %241 : vector<8x1xf32>
    %243 = vector.broadcast %242 : vector<8x1xf32> to vector<8x32xf32>
    %244 = arith.mulf %239, %243 : vector<8x32xf32>
    %245 = vector.broadcast %225 : vector<1x32xf32> to vector<8x32xf32>
    %246 = arith.mulf %244, %245 : vector<8x32xf32>
    %247 = vector.broadcast %226 : vector<1x32xf32> to vector<8x32xf32>
    %248 = arith.addf %246, %247 : vector<8x32xf32>
    %c0_83 = arith.constant 0 : index
    %c0_84 = arith.constant 0 : index
    %c0_85 = arith.constant 0 : index
    %249 = vector.load %arg3[%c0_83, %c0_84, %c0_85] : memref<1x16x32xf32, #tpu.memory_space<vmem>>, vector<1x16x32xf32>
    %250 = vector.shape_cast %249 : vector<1x16x32xf32> to vector<16x32xf32>
    %c0_86 = arith.constant 0 : index
    %c0_87 = arith.constant 0 : index
    %c0_88 = arith.constant 0 : index
    %251 = vector.load %arg13[%c0_86, %c0_87, %c0_88] : memref<1x32x32xf32, #tpu.memory_space<vmem>>, vector<1x32x32xf32>
    %252 = vector.shape_cast %251 : vector<1x32x32xf32> to vector<32x32xf32>
    %c0_89 = arith.constant 0 : index
    %c0_90 = arith.constant 0 : index
    %c0_91 = arith.constant 0 : index
    %253 = vector.load %arg14[%c0_89, %c0_90, %c0_91] : memref<1x32x64xf32, #tpu.memory_space<vmem>>, vector<1x32x64xf32>
    %254 = vector.shape_cast %253 : vector<1x32x64xf32> to vector<32x64xf32>
    %c0_92 = arith.constant 0 : index
    %c0_93 = arith.constant 0 : index
    %c0_94 = arith.constant 0 : index
    %255 = vector.load %arg15[%c0_92, %c0_93, %c0_94] : memref<1x1x64xf32, #tpu.memory_space<vmem>>, vector<1x1x64xf32>
    %256 = vector.shape_cast %255 : vector<1x1x64xf32> to vector<1x64xf32>
    %c0_95 = arith.constant 0 : index
    %c0_96 = arith.constant 0 : index
    %c0_97 = arith.constant 0 : index
    %257 = vector.load %arg16[%c0_95, %c0_96, %c0_97] : memref<1x32x32xf32, #tpu.memory_space<vmem>>, vector<1x32x32xf32>
    %258 = vector.shape_cast %257 : vector<1x32x32xf32> to vector<32x32xf32>
    %c0_98 = arith.constant 0 : index
    %c0_99 = arith.constant 0 : index
    %c0_100 = arith.constant 0 : index
    %259 = vector.load %arg17[%c0_98, %c0_99, %c0_100] : memref<1x32x128xf32, #tpu.memory_space<vmem>>, vector<1x32x128xf32>
    %260 = vector.shape_cast %259 : vector<1x32x128xf32> to vector<32x128xf32>
    %c0_101 = arith.constant 0 : index
    %c0_102 = arith.constant 0 : index
    %c0_103 = arith.constant 0 : index
    %261 = vector.load %arg18[%c0_101, %c0_102, %c0_103] : memref<1x1x128xf32, #tpu.memory_space<vmem>>, vector<1x1x128xf32>
    %262 = vector.shape_cast %261 : vector<1x1x128xf32> to vector<1x128xf32>
    %c0_104 = arith.constant 0 : index
    %c0_105 = arith.constant 0 : index
    %c0_106 = arith.constant 0 : index
    %263 = vector.load %arg19[%c0_104, %c0_105, %c0_106] : memref<1x128x32xf32, #tpu.memory_space<vmem>>, vector<1x128x32xf32>
    %264 = vector.shape_cast %263 : vector<1x128x32xf32> to vector<128x32xf32>
    %265 = vector.extract_strided_slice %224 {offsets = [2, 0], sizes = [7, 32], strides = [1, 1]} : vector<9x32xf32> to vector<7x32xf32>
    %c0_107 = arith.constant 0 : index
    %c0_108 = arith.constant 0 : index
    %c0_109 = arith.constant 0 : index
    %266 = vector.load %arg21[%c0_107, %c0_108, %c0_109] : memref<1x2x32xf32, #tpu.memory_space<vmem>>, vector<1x2x32xf32>
    %267 = vector.shape_cast %266 : vector<1x2x32xf32> to vector<2x32xf32>
    %268 = vector.extract_strided_slice %265 {offsets = [0, 0], sizes = [1, 32], strides = [1, 1]} : vector<7x32xf32> to vector<1x32xf32>
    %269 = vector.extract_strided_slice %265 {offsets = [1, 0], sizes = [1, 32], strides = [1, 1]} : vector<7x32xf32> to vector<1x32xf32>
    %cst_110 = arith.constant dense<0.000000e+00> : vector<8xf32>
    %270 = vector.multi_reduction <add>, %248, %cst_110 [1] : vector<8x32xf32> to vector<8xf32>
    %271 = vector.shape_cast %270 : vector<8xf32> to vector<8x1xf32>
    %cst_111 = arith.constant 3.200000e+01 : f32
    %272 = vector.broadcast %cst_111 : f32 to vector<8x1xf32>
    %273 = arith.divf %271, %272 : vector<8x1xf32>
    %274 = vector.broadcast %273 : vector<8x1xf32> to vector<8x32xf32>
    %275 = arith.subf %248, %274 : vector<8x32xf32>
    %276 = arith.mulf %275, %275 : vector<8x32xf32>
    %cst_112 = arith.constant dense<0.000000e+00> : vector<8xf32>
    %277 = vector.multi_reduction <add>, %276, %cst_112 [1] : vector<8x32xf32> to vector<8xf32>
    %278 = vector.shape_cast %277 : vector<8xf32> to vector<8x1xf32>
    %cst_113 = arith.constant 3.200000e+01 : f32
    %279 = vector.broadcast %cst_113 : f32 to vector<8x1xf32>
    %280 = arith.divf %278, %279 : vector<8x1xf32>
    %281 = vector.broadcast %273 : vector<8x1xf32> to vector<8x32xf32>
    %282 = arith.subf %248, %281 : vector<8x32xf32>
    %cst_114 = arith.constant 9.99999974E-6 : f32
    %283 = vector.broadcast %cst_114 : f32 to vector<8x1xf32>
    %284 = arith.addf %280, %283 : vector<8x1xf32>
    %285 = math.rsqrt %284 : vector<8x1xf32>
    %286 = vector.broadcast %285 : vector<8x1xf32> to vector<8x32xf32>
    %287 = arith.mulf %282, %286 : vector<8x32xf32>
    %288 = vector.broadcast %268 : vector<1x32xf32> to vector<8x32xf32>
    %289 = arith.mulf %287, %288 : vector<8x32xf32>
    %290 = vector.broadcast %269 : vector<1x32xf32> to vector<8x32xf32>
    %291 = arith.addf %289, %290 : vector<8x32xf32>
    %292 = vector.extract_strided_slice %267 {offsets = [0, 0], sizes = [1, 32], strides = [1, 1]} : vector<2x32xf32> to vector<1x32xf32>
    %293 = vector.extract_strided_slice %267 {offsets = [1, 0], sizes = [1, 32], strides = [1, 1]} : vector<2x32xf32> to vector<1x32xf32>
    %cst_115 = arith.constant dense<0.000000e+00> : vector<16xf32>
    %294 = vector.multi_reduction <add>, %250, %cst_115 [1] : vector<16x32xf32> to vector<16xf32>
    %295 = vector.shape_cast %294 : vector<16xf32> to vector<16x1xf32>
    %cst_116 = arith.constant 3.200000e+01 : f32
    %296 = vector.broadcast %cst_116 : f32 to vector<16x1xf32>
    %297 = arith.divf %295, %296 : vector<16x1xf32>
    %298 = vector.broadcast %297 : vector<16x1xf32> to vector<16x32xf32>
    %299 = arith.subf %250, %298 : vector<16x32xf32>
    %300 = arith.mulf %299, %299 : vector<16x32xf32>
    %cst_117 = arith.constant dense<0.000000e+00> : vector<16xf32>
    %301 = vector.multi_reduction <add>, %300, %cst_117 [1] : vector<16x32xf32> to vector<16xf32>
    %302 = vector.shape_cast %301 : vector<16xf32> to vector<16x1xf32>
    %cst_118 = arith.constant 3.200000e+01 : f32
    %303 = vector.broadcast %cst_118 : f32 to vector<16x1xf32>
    %304 = arith.divf %302, %303 : vector<16x1xf32>
    %305 = vector.broadcast %297 : vector<16x1xf32> to vector<16x32xf32>
    %306 = arith.subf %250, %305 : vector<16x32xf32>
    %cst_119 = arith.constant 9.99999974E-6 : f32
    %307 = vector.broadcast %cst_119 : f32 to vector<16x1xf32>
    %308 = arith.addf %304, %307 : vector<16x1xf32>
    %309 = math.rsqrt %308 : vector<16x1xf32>
    %310 = vector.broadcast %309 : vector<16x1xf32> to vector<16x32xf32>
    %311 = arith.mulf %306, %310 : vector<16x32xf32>
    %312 = vector.broadcast %292 : vector<1x32xf32> to vector<16x32xf32>
    %313 = arith.mulf %311, %312 : vector<16x32xf32>
    %314 = vector.broadcast %293 : vector<1x32xf32> to vector<16x32xf32>
    %315 = arith.addf %313, %314 : vector<16x32xf32>
    %cst_120 = arith.constant dense<0.000000e+00> : vector<8x32xf32>
    %316 = tpu.matmul %291, %252, %cst_120 {dimension_numbers = #tpu.dot_dimension_numbers<[1], [0], [0], [1], [0, 0, 1, 1], [], []>} : vector<8x32xf32>, vector<32x32xf32>, vector<8x32xf32> -> vector<8x32xf32>
    %317 = vector.extract_strided_slice %265 {offsets = [2, 0], sizes = [1, 32], strides = [1, 1]} : vector<7x32xf32> to vector<1x32xf32>
    %318 = vector.broadcast %317 : vector<1x32xf32> to vector<8x32xf32>
    %319 = arith.addf %316, %318 : vector<8x32xf32>
    %cst_121 = arith.constant dense<0.000000e+00> : vector<16x64xf32>
    %320 = tpu.matmul %315, %254, %cst_121 {dimension_numbers = #tpu.dot_dimension_numbers<[1], [0], [0], [1], [0, 0, 1, 1], [], []>} : vector<16x32xf32>, vector<32x64xf32>, vector<16x64xf32> -> vector<16x64xf32>
    %321 = vector.broadcast %256 : vector<1x64xf32> to vector<16x64xf32>
    %322 = arith.addf %320, %321 : vector<16x64xf32>
    %323 = vector.extract_strided_slice %322 {offsets = [0, 0], sizes = [16, 32], strides = [1, 1]} : vector<16x64xf32> to vector<16x32xf32>
    %324 = vector.extract_strided_slice %322 {offsets = [0, 32], sizes = [16, 32], strides = [1, 1]} : vector<16x64xf32> to vector<16x32xf32>
    %325 = vector.extract_strided_slice %319 {offsets = [0, 0], sizes = [8, 8], strides = [1, 1]} : vector<8x32xf32> to vector<8x8xf32>
    %326 = vector.extract_strided_slice %323 {offsets = [0, 0], sizes = [16, 8], strides = [1, 1]} : vector<16x32xf32> to vector<16x8xf32>
    %327 = vector.extract_strided_slice %324 {offsets = [0, 0], sizes = [16, 8], strides = [1, 1]} : vector<16x32xf32> to vector<16x8xf32>
    %328 = tpu.transpose %326, [1, 0] : vector<16x8xf32> -> vector<8x16xf32>
    %cst_122 = arith.constant dense<0.000000e+00> : vector<8x16xf32>
    %329 = tpu.matmul %325, %328, %cst_122 {dimension_numbers = #tpu.dot_dimension_numbers<[1], [0], [0], [1], [0, 0, 1, 1], [], []>} : vector<8x8xf32>, vector<8x16xf32>, vector<8x16xf32> -> vector<8x16xf32>
    %cst_123 = arith.constant dense<0xFF800000> : vector<8xf32>
    %330 = vector.multi_reduction <maximumf>, %329, %cst_123 [1] : vector<8x16xf32> to vector<8xf32>
    %331 = vector.shape_cast %330 : vector<8xf32> to vector<8x1xf32>
    %332 = vector.broadcast %331 : vector<8x1xf32> to vector<8x16xf32>
    %333 = arith.subf %329, %332 : vector<8x16xf32>
    %334 = math.exp %333 : vector<8x16xf32>
    %cst_124 = arith.constant dense<0.000000e+00> : vector<8xf32>
    %335 = vector.multi_reduction <add>, %334, %cst_124 [1] : vector<8x16xf32> to vector<8xf32>
    %336 = vector.shape_cast %335 : vector<8xf32> to vector<8x1xf32>
    %337 = vector.broadcast %336 : vector<8x1xf32> to vector<8x16xf32>
    %338 = arith.divf %334, %337 : vector<8x16xf32>
    %cst_125 = arith.constant dense<0.000000e+00> : vector<8x8xf32>
    %339 = tpu.matmul %338, %327, %cst_125 {dimension_numbers = #tpu.dot_dimension_numbers<[1], [0], [0], [1], [0, 0, 1, 1], [], []>} : vector<8x16xf32>, vector<16x8xf32>, vector<8x8xf32> -> vector<8x8xf32>
    %340 = vector.extract_strided_slice %319 {offsets = [0, 8], sizes = [8, 8], strides = [1, 1]} : vector<8x32xf32> to vector<8x8xf32>
    %341 = vector.extract_strided_slice %323 {offsets = [0, 8], sizes = [16, 8], strides = [1, 1]} : vector<16x32xf32> to vector<16x8xf32>
    %342 = vector.extract_strided_slice %324 {offsets = [0, 8], sizes = [16, 8], strides = [1, 1]} : vector<16x32xf32> to vector<16x8xf32>
    %343 = tpu.transpose %341, [1, 0] : vector<16x8xf32> -> vector<8x16xf32>
    %cst_126 = arith.constant dense<0.000000e+00> : vector<8x16xf32>
    %344 = tpu.matmul %340, %343, %cst_126 {dimension_numbers = #tpu.dot_dimension_numbers<[1], [0], [0], [1], [0, 0, 1, 1], [], []>} : vector<8x8xf32>, vector<8x16xf32>, vector<8x16xf32> -> vector<8x16xf32>
    %cst_127 = arith.constant dense<0xFF800000> : vector<8xf32>
    %345 = vector.multi_reduction <maximumf>, %344, %cst_127 [1] : vector<8x16xf32> to vector<8xf32>
    %346 = vector.shape_cast %345 : vector<8xf32> to vector<8x1xf32>
    %347 = vector.broadcast %346 : vector<8x1xf32> to vector<8x16xf32>
    %348 = arith.subf %344, %347 : vector<8x16xf32>
    %349 = math.exp %348 : vector<8x16xf32>
    %cst_128 = arith.constant dense<0.000000e+00> : vector<8xf32>
    %350 = vector.multi_reduction <add>, %349, %cst_128 [1] : vector<8x16xf32> to vector<8xf32>
    %351 = vector.shape_cast %350 : vector<8xf32> to vector<8x1xf32>
    %352 = vector.broadcast %351 : vector<8x1xf32> to vector<8x16xf32>
    %353 = arith.divf %349, %352 : vector<8x16xf32>
    %cst_129 = arith.constant dense<0.000000e+00> : vector<8x8xf32>
    %354 = tpu.matmul %353, %342, %cst_129 {dimension_numbers = #tpu.dot_dimension_numbers<[1], [0], [0], [1], [0, 0, 1, 1], [], []>} : vector<8x16xf32>, vector<16x8xf32>, vector<8x8xf32> -> vector<8x8xf32>
    %355 = vector.extract_strided_slice %319 {offsets = [0, 16], sizes = [8, 8], strides = [1, 1]} : vector<8x32xf32> to vector<8x8xf32>
    %356 = vector.extract_strided_slice %323 {offsets = [0, 16], sizes = [16, 8], strides = [1, 1]} : vector<16x32xf32> to vector<16x8xf32>
    %357 = vector.extract_strided_slice %324 {offsets = [0, 16], sizes = [16, 8], strides = [1, 1]} : vector<16x32xf32> to vector<16x8xf32>
    %358 = tpu.transpose %356, [1, 0] : vector<16x8xf32> -> vector<8x16xf32>
    %cst_130 = arith.constant dense<0.000000e+00> : vector<8x16xf32>
    %359 = tpu.matmul %355, %358, %cst_130 {dimension_numbers = #tpu.dot_dimension_numbers<[1], [0], [0], [1], [0, 0, 1, 1], [], []>} : vector<8x8xf32>, vector<8x16xf32>, vector<8x16xf32> -> vector<8x16xf32>
    %cst_131 = arith.constant dense<0xFF800000> : vector<8xf32>
    %360 = vector.multi_reduction <maximumf>, %359, %cst_131 [1] : vector<8x16xf32> to vector<8xf32>
    %361 = vector.shape_cast %360 : vector<8xf32> to vector<8x1xf32>
    %362 = vector.broadcast %361 : vector<8x1xf32> to vector<8x16xf32>
    %363 = arith.subf %359, %362 : vector<8x16xf32>
    %364 = math.exp %363 : vector<8x16xf32>
    %cst_132 = arith.constant dense<0.000000e+00> : vector<8xf32>
    %365 = vector.multi_reduction <add>, %364, %cst_132 [1] : vector<8x16xf32> to vector<8xf32>
    %366 = vector.shape_cast %365 : vector<8xf32> to vector<8x1xf32>
    %367 = vector.broadcast %366 : vector<8x1xf32> to vector<8x16xf32>
    %368 = arith.divf %364, %367 : vector<8x16xf32>
    %cst_133 = arith.constant dense<0.000000e+00> : vector<8x8xf32>
    %369 = tpu.matmul %368, %357, %cst_133 {dimension_numbers = #tpu.dot_dimension_numbers<[1], [0], [0], [1], [0, 0, 1, 1], [], []>} : vector<8x16xf32>, vector<16x8xf32>, vector<8x8xf32> -> vector<8x8xf32>
    %370 = vector.extract_strided_slice %319 {offsets = [0, 24], sizes = [8, 8], strides = [1, 1]} : vector<8x32xf32> to vector<8x8xf32>
    %371 = vector.extract_strided_slice %323 {offsets = [0, 24], sizes = [16, 8], strides = [1, 1]} : vector<16x32xf32> to vector<16x8xf32>
    %372 = vector.extract_strided_slice %324 {offsets = [0, 24], sizes = [16, 8], strides = [1, 1]} : vector<16x32xf32> to vector<16x8xf32>
    %373 = tpu.transpose %371, [1, 0] : vector<16x8xf32> -> vector<8x16xf32>
    %cst_134 = arith.constant dense<0.000000e+00> : vector<8x16xf32>
    %374 = tpu.matmul %370, %373, %cst_134 {dimension_numbers = #tpu.dot_dimension_numbers<[1], [0], [0], [1], [0, 0, 1, 1], [], []>} : vector<8x8xf32>, vector<8x16xf32>, vector<8x16xf32> -> vector<8x16xf32>
    %cst_135 = arith.constant dense<0xFF800000> : vector<8xf32>
    %375 = vector.multi_reduction <maximumf>, %374, %cst_135 [1] : vector<8x16xf32> to vector<8xf32>
    %376 = vector.shape_cast %375 : vector<8xf32> to vector<8x1xf32>
    %377 = vector.broadcast %376 : vector<8x1xf32> to vector<8x16xf32>
    %378 = arith.subf %374, %377 : vector<8x16xf32>
    %379 = math.exp %378 : vector<8x16xf32>
    %cst_136 = arith.constant dense<0.000000e+00> : vector<8xf32>
    %380 = vector.multi_reduction <add>, %379, %cst_136 [1] : vector<8x16xf32> to vector<8xf32>
    %381 = vector.shape_cast %380 : vector<8xf32> to vector<8x1xf32>
    %382 = vector.broadcast %381 : vector<8x1xf32> to vector<8x16xf32>
    %383 = arith.divf %379, %382 : vector<8x16xf32>
    %cst_137 = arith.constant dense<0.000000e+00> : vector<8x8xf32>
    %384 = tpu.matmul %383, %372, %cst_137 {dimension_numbers = #tpu.dot_dimension_numbers<[1], [0], [0], [1], [0, 0, 1, 1], [], []>} : vector<8x16xf32>, vector<16x8xf32>, vector<8x8xf32> -> vector<8x8xf32>
    %385 = tpu.concatenate %339, %354, %369, %384 in 1 : vector<8x8xf32>, vector<8x8xf32>, vector<8x8xf32>, vector<8x8xf32> -> vector<8x32xf32>
    %cst_138 = arith.constant dense<0.000000e+00> : vector<8x32xf32>
    %386 = tpu.matmul %385, %258, %cst_138 {dimension_numbers = #tpu.dot_dimension_numbers<[1], [0], [0], [1], [0, 0, 1, 1], [], []>} : vector<8x32xf32>, vector<32x32xf32>, vector<8x32xf32> -> vector<8x32xf32>
    %387 = vector.extract_strided_slice %265 {offsets = [3, 0], sizes = [1, 32], strides = [1, 1]} : vector<7x32xf32> to vector<1x32xf32>
    %388 = vector.broadcast %387 : vector<1x32xf32> to vector<8x32xf32>
    %389 = arith.addf %386, %388 : vector<8x32xf32>
    %390 = arith.addf %248, %389 : vector<8x32xf32>
    %391 = vector.extract_strided_slice %265 {offsets = [4, 0], sizes = [1, 32], strides = [1, 1]} : vector<7x32xf32> to vector<1x32xf32>
    %392 = vector.extract_strided_slice %265 {offsets = [5, 0], sizes = [1, 32], strides = [1, 1]} : vector<7x32xf32> to vector<1x32xf32>
    %cst_139 = arith.constant dense<0.000000e+00> : vector<8xf32>
    %393 = vector.multi_reduction <add>, %390, %cst_139 [1] : vector<8x32xf32> to vector<8xf32>
    %394 = vector.shape_cast %393 : vector<8xf32> to vector<8x1xf32>
    %cst_140 = arith.constant 3.200000e+01 : f32
    %395 = vector.broadcast %cst_140 : f32 to vector<8x1xf32>
    %396 = arith.divf %394, %395 : vector<8x1xf32>
    %397 = vector.broadcast %396 : vector<8x1xf32> to vector<8x32xf32>
    %398 = arith.subf %390, %397 : vector<8x32xf32>
    %399 = arith.mulf %398, %398 : vector<8x32xf32>
    %cst_141 = arith.constant dense<0.000000e+00> : vector<8xf32>
    %400 = vector.multi_reduction <add>, %399, %cst_141 [1] : vector<8x32xf32> to vector<8xf32>
    %401 = vector.shape_cast %400 : vector<8xf32> to vector<8x1xf32>
    %cst_142 = arith.constant 3.200000e+01 : f32
    %402 = vector.broadcast %cst_142 : f32 to vector<8x1xf32>
    %403 = arith.divf %401, %402 : vector<8x1xf32>
    %404 = vector.broadcast %396 : vector<8x1xf32> to vector<8x32xf32>
    %405 = arith.subf %390, %404 : vector<8x32xf32>
    %cst_143 = arith.constant 9.99999974E-6 : f32
    %406 = vector.broadcast %cst_143 : f32 to vector<8x1xf32>
    %407 = arith.addf %403, %406 : vector<8x1xf32>
    %408 = math.rsqrt %407 : vector<8x1xf32>
    %409 = vector.broadcast %408 : vector<8x1xf32> to vector<8x32xf32>
    %410 = arith.mulf %405, %409 : vector<8x32xf32>
    %411 = vector.broadcast %391 : vector<1x32xf32> to vector<8x32xf32>
    %412 = arith.mulf %410, %411 : vector<8x32xf32>
    %413 = vector.broadcast %392 : vector<1x32xf32> to vector<8x32xf32>
    %414 = arith.addf %412, %413 : vector<8x32xf32>
    %cst_144 = arith.constant dense<0.000000e+00> : vector<8x128xf32>
    %415 = tpu.matmul %414, %260, %cst_144 {dimension_numbers = #tpu.dot_dimension_numbers<[1], [0], [0], [1], [0, 0, 1, 1], [], []>} : vector<8x32xf32>, vector<32x128xf32>, vector<8x128xf32> -> vector<8x128xf32>
    %416 = vector.broadcast %262 : vector<1x128xf32> to vector<8x128xf32>
    %417 = arith.addf %415, %416 : vector<8x128xf32>
    %cst_145 = arith.constant 5.000000e-01 : f32
    %418 = vector.broadcast %cst_145 : f32 to vector<8x128xf32>
    %419 = arith.mulf %418, %417 : vector<8x128xf32>
    %cst_146 = arith.constant 2.000000e+00 : f32
    %420 = math.sqrt %cst_146 : f32
    %cst_147 = arith.constant 1.000000e+00 : f32
    %421 = arith.divf %cst_147, %420 : f32
    %422 = vector.broadcast %421 : f32 to vector<8x128xf32>
    %423 = arith.mulf %417, %422 : vector<8x128xf32>
    %424 = math.erf %423 : vector<8x128xf32>
    %cst_148 = arith.constant 1.000000e+00 : f32
    %425 = vector.broadcast %cst_148 : f32 to vector<8x128xf32>
    %426 = arith.addf %425, %424 : vector<8x128xf32>
    %427 = arith.mulf %419, %426 : vector<8x128xf32>
    %cst_149 = arith.constant dense<0.000000e+00> : vector<8x32xf32>
    %428 = tpu.matmul %427, %264, %cst_149 {dimension_numbers = #tpu.dot_dimension_numbers<[1], [0], [0], [1], [0, 0, 1, 1], [], []>} : vector<8x128xf32>, vector<128x32xf32>, vector<8x32xf32> -> vector<8x32xf32>
    %429 = arith.addf %390, %428 : vector<8x32xf32>
    %430 = vector.extract_strided_slice %265 {offsets = [6, 0], sizes = [1, 32], strides = [1, 1]} : vector<7x32xf32> to vector<1x32xf32>
    %431 = vector.broadcast %430 : vector<1x32xf32> to vector<8x32xf32>
    %432 = arith.addf %429, %431 : vector<8x32xf32>
    %433 = arith.addf %248, %432 : vector<8x32xf32>
    %c0_150 = arith.constant 0 : index
    %c0_151 = arith.constant 0 : index
    %434 = vector.load %arg25[%c0_150, %c0_151] : memref<8x32xf32, #tpu.memory_space<vmem>>, vector<8x32xf32>
    tpu.vector_store %arg25[%c0_150, %c0_151], %433 {strides = array<i32>} : memref<8x32xf32, #tpu.memory_space<vmem>>, vector<8x32xf32>,
    %c1_i32 = arith.constant 1 : i32
    %435 = arith.cmpi eq, %arg1, %c1_i32 : i32
    %436 = arith.extui %435 : i1 to i32
    %c0_i32_152 = arith.constant 0 : i32
    %437 = arith.cmpi ne, %436, %c0_i32_152 : i32
    scf.if %437 {
      %cst_153 = arith.constant 0.000000e+00 : f32
      %438 = vector.broadcast %cst_153 : f32 to vector<8x32xf32>
      %439 = arith.maximumf %433, %438 : vector<8x32xf32>
      %c0_154 = arith.constant 0 : index
      %c0_155 = arith.constant 0 : index
      %440 = vector.load %arg22[%c0_154, %c0_155] : memref<32x128xf32, #tpu.memory_space<vmem>>, vector<32x128xf32>
      %cst_156 = arith.constant dense<0.000000e+00> : vector<8x128xf32>
      %441 = tpu.matmul %439, %440, %cst_156 {dimension_numbers = #tpu.dot_dimension_numbers<[1], [0], [0], [1], [0, 0, 1, 1], [], []>} : vector<8x32xf32>, vector<32x128xf32>, vector<8x128xf32> -> vector<8x128xf32>
      %c0_157 = arith.constant 0 : index
      %c0_158 = arith.constant 0 : index
      %442 = vector.load %arg23[%c0_157, %c0_158] : memref<1x128xf32, #tpu.memory_space<vmem>>, vector<1x128xf32>
      %443 = vector.broadcast %442 : vector<1x128xf32> to vector<8x128xf32>
      %444 = arith.addf %441, %443 : vector<8x128xf32>
      %c0_159 = arith.constant 0 : index
      %c0_160 = arith.constant 0 : index
      %c0_161 = arith.constant 0 : index
      %445 = vector.load %arg24[%c0_159, %c0_160, %c0_161] : memref<1x8x128xf32, #tpu.memory_space<vmem>>, vector<1x8x128xf32>
      %446 = vector.shape_cast %445 : vector<1x8x128xf32> to vector<8x128xf32>
      %447 = vector.shape_cast %444 : vector<8x128xf32> to vector<1x8x128xf32>
      tpu.vector_store %arg24[%c0_159, %c0_160, %c0_161], %447 {strides = array<i32>} : memref<1x8x128xf32, #tpu.memory_space<vmem>>, vector<1x8x128xf32>,
    } else {
    }
    return
  }
  func.func @transform_0(%arg0: i32, %arg1: i32) -> (i32, i32, i32) {
    %c0_i32 = arith.constant 0 : i32
    %c0_i32_0 = arith.constant 0 : i32
    %c0_i32_1 = arith.constant 0 : i32
    return %arg0, %c0_i32, %c0_i32_0 : i32, i32, i32
  }
  func.func @transform_1(%arg0: i32, %arg1: i32) -> (i32, i32, i32) {
    %c0_i32 = arith.constant 0 : i32
    %c0_i32_0 = arith.constant 0 : i32
    %c0_i32_1 = arith.constant 0 : i32
    return %arg0, %c0_i32, %c0_i32_0 : i32, i32, i32
  }
  func.func @transform_2(%arg0: i32, %arg1: i32) -> (i32, i32, i32) {
    %c0_i32 = arith.constant 0 : i32
    %c0_i32_0 = arith.constant 0 : i32
    %c0_i32_1 = arith.constant 0 : i32
    return %arg1, %c0_i32, %c0_i32_0 : i32, i32, i32
  }
  func.func @transform_3(%arg0: i32, %arg1: i32) -> (i32, i32, i32) {
    %c0_i32 = arith.constant 0 : i32
    %c0_i32_0 = arith.constant 0 : i32
    %c0_i32_1 = arith.constant 0 : i32
    return %arg1, %c0_i32, %c0_i32_0 : i32, i32, i32
  }
  func.func @transform_4(%arg0: i32, %arg1: i32) -> (i32, i32, i32) {
    %c0_i32 = arith.constant 0 : i32
    %c0_i32_0 = arith.constant 0 : i32
    %c0_i32_1 = arith.constant 0 : i32
    return %arg1, %c0_i32, %c0_i32_0 : i32, i32, i32
  }
  func.func @transform_5(%arg0: i32, %arg1: i32) -> (i32, i32, i32) {
    %c0_i32 = arith.constant 0 : i32
    %c0_i32_0 = arith.constant 0 : i32
    %c0_i32_1 = arith.constant 0 : i32
    return %arg1, %c0_i32, %c0_i32_0 : i32, i32, i32
  }
  func.func @transform_6(%arg0: i32, %arg1: i32) -> (i32, i32, i32) {
    %c0_i32 = arith.constant 0 : i32
    %c0_i32_0 = arith.constant 0 : i32
    %c0_i32_1 = arith.constant 0 : i32
    return %arg1, %c0_i32, %c0_i32_0 : i32, i32, i32
  }
  func.func @transform_7(%arg0: i32, %arg1: i32) -> (i32, i32, i32) {
    %c0_i32 = arith.constant 0 : i32
    %c0_i32_0 = arith.constant 0 : i32
    %c0_i32_1 = arith.constant 0 : i32
    return %arg1, %c0_i32, %c0_i32_0 : i32, i32, i32
  }
  func.func @transform_8(%arg0: i32, %arg1: i32) -> (i32, i32, i32) {
    %c0_i32 = arith.constant 0 : i32
    %c0_i32_0 = arith.constant 0 : i32
    %c0_i32_1 = arith.constant 0 : i32
    return %arg1, %c0_i32, %c0_i32_0 : i32, i32, i32
  }
  func.func @transform_9(%arg0: i32, %arg1: i32) -> (i32, i32, i32) {
    %c0_i32 = arith.constant 0 : i32
    %c0_i32_0 = arith.constant 0 : i32
    %c0_i32_1 = arith.constant 0 : i32
    return %arg1, %c0_i32, %c0_i32_0 : i32, i32, i32
  }
  func.func @transform_10(%arg0: i32, %arg1: i32) -> (i32, i32, i32) {
    %c0_i32 = arith.constant 0 : i32
    %c0_i32_0 = arith.constant 0 : i32
    %c0_i32_1 = arith.constant 0 : i32
    return %arg1, %c0_i32, %c0_i32_0 : i32, i32, i32
  }
  func.func @transform_11(%arg0: i32, %arg1: i32) -> (i32, i32, i32) {
    %c0_i32 = arith.constant 0 : i32
    %c0_i32_0 = arith.constant 0 : i32
    %c0_i32_1 = arith.constant 0 : i32
    return %arg1, %c0_i32, %c0_i32_0 : i32, i32, i32
  }
  func.func @transform_12(%arg0: i32, %arg1: i32) -> (i32, i32, i32) {
    %c0_i32 = arith.constant 0 : i32
    %c0_i32_0 = arith.constant 0 : i32
    %c0_i32_1 = arith.constant 0 : i32
    return %arg1, %c0_i32, %c0_i32_0 : i32, i32, i32
  }
  func.func @transform_13(%arg0: i32, %arg1: i32) -> (i32, i32, i32) {
    %c0_i32 = arith.constant 0 : i32
    %c0_i32_0 = arith.constant 0 : i32
    %c0_i32_1 = arith.constant 0 : i32
    return %arg1, %c0_i32, %c0_i32_0 : i32, i32, i32
  }
  func.func @transform_14(%arg0: i32, %arg1: i32) -> (i32, i32, i32) {
    %c0_i32 = arith.constant 0 : i32
    %c0_i32_0 = arith.constant 0 : i32
    %c0_i32_1 = arith.constant 0 : i32
    return %arg1, %c0_i32, %c0_i32_0 : i32, i32, i32
  }
  func.func @transform_15(%arg0: i32, %arg1: i32) -> (i32, i32, i32) {
    %c0_i32 = arith.constant 0 : i32
    %c0_i32_0 = arith.constant 0 : i32
    %c0_i32_1 = arith.constant 0 : i32
    return %arg1, %c0_i32, %c0_i32_0 : i32, i32, i32
  }
  func.func @transform_16(%arg0: i32, %arg1: i32) -> (i32, i32, i32) {
    %c0_i32 = arith.constant 0 : i32
    %c0_i32_0 = arith.constant 0 : i32
    %c0_i32_1 = arith.constant 0 : i32
    return %arg1, %c0_i32, %c0_i32_0 : i32, i32, i32
  }
  func.func @transform_17(%arg0: i32, %arg1: i32) -> (i32, i32, i32) {
    %c0_i32 = arith.constant 0 : i32
    %c0_i32_0 = arith.constant 0 : i32
    %c0_i32_1 = arith.constant 0 : i32
    return %arg1, %c0_i32, %c0_i32_0 : i32, i32, i32
  }
  func.func @transform_18(%arg0: i32, %arg1: i32) -> (i32, i32, i32) {
    %c0_i32 = arith.constant 0 : i32
    %c0_i32_0 = arith.constant 0 : i32
    %c0_i32_1 = arith.constant 0 : i32
    return %arg1, %c0_i32, %c0_i32_0 : i32, i32, i32
  }
  func.func @transform_19(%arg0: i32, %arg1: i32) -> (i32, i32, i32) {
    %c0_i32 = arith.constant 0 : i32
    %c0_i32_0 = arith.constant 0 : i32
    %c0_i32_1 = arith.constant 0 : i32
    return %arg1, %c0_i32, %c0_i32_0 : i32, i32, i32
  }
  func.func @transform_20(%arg0: i32, %arg1: i32) -> (i32, i32) {
    %c0_i32 = arith.constant 0 : i32
    %c0_i32_0 = arith.constant 0 : i32
    %c0_i32_1 = arith.constant 0 : i32
    return %c0_i32, %c0_i32_0 : i32, i32
  }
  func.func @transform_21(%arg0: i32, %arg1: i32) -> (i32, i32) {
    %c0_i32 = arith.constant 0 : i32
    %c0_i32_0 = arith.constant 0 : i32
    %c0_i32_1 = arith.constant 0 : i32
    return %c0_i32, %c0_i32_0 : i32, i32
  }
  func.func @transform_22(%arg0: i32, %arg1: i32) -> (i32, i32, i32) {
    %c0_i32 = arith.constant 0 : i32
    %c0_i32_0 = arith.constant 0 : i32
    %c0_i32_1 = arith.constant 0 : i32
    return %arg0, %c0_i32, %c0_i32_0 : i32, i32, i32
  }
}

</mosaic_0001>

<bundles_post_ra>
// kernel: tpu_custom_call.1
= control target key start
LH: loop header
LB: loop body
LE: loop exit
PB: predicated region body
PF: predicated region fallthrough
CT: control target
= control target key end

     0   :  { %s3989_s0 = inlined_call_operand.vmem [shape: f32[2,8,32], index: 0, kind: input, shape index: {}]   ;;  %s3990_s1 = inlined_call_operand.vmem [shape: f32[2,16,32], index: 1, kind: input, shape index: {}]   ;;  %s3991_s2 = inlined_call_operand.vmem [shape: f32[2,32,32], index: 2, kind: input, shape index: {}]   ;;  %s3992_s3 = inlined_call_operand.vmem [shape: f32[2,32,64], index: 3, kind: input, shape index: {}]   ;;  %s3993_s4 = inlined_call_operand.vmem [shape: f32[2,1,64], index: 4, kind: input, shape index: {}]   ;;  %s3994_s5 = inlined_call_operand.vmem [shape: f32[2,32,32], index: 5, kind: input, shape index: {}]   ;;  %s3995_s6 = inlined_call_operand.vmem [shape: f32[2,32,128], index: 6, kind: input, shape index: {}]   ;;  %s3996_s7 = inlined_call_operand.hbm [shape: f32[2,1,128], index: 7, kind: input, shape index: {}]   ;;  %s3997_s8 = inlined_call_operand.vmem [shape: f32[2,128,32], index: 8, kind: input, shape index: {}]   ;;  %s3998_s9 = inlined_call_operand.vmem [shape: f32[2,9,32], index: 9, kind: input, shape index: {}]   ;;  %s3999_s10 = inlined_call_operand.vmem [shape: f32[2,2,32], index: 10, kind: input, shape index: {}]   ;;  %s4000_s11 = inlined_call_operand.vmem [shape: f32[2,32,32], index: 11, kind: input, shape index: {}]   ;;  %s4001_s12 = inlined_call_operand.vmem [shape: f32[2,32,64], index: 12, kind: input, shape index: {}]   ;;  %s4002_s13 = inlined_call_operand.hbm [shape: f32[2,1,64], index: 13, kind: input, shape index: {}]   ;;  %s4003_s14 = inlined_call_operand.vmem [shape: f32[2,32,32], index: 14, kind: input, shape index: {}]   ;;  %s4004_s15 = inlined_call_operand.vmem [shape: f32[2,32,128], index: 15, kind: input, shape index: {}]   ;;  %s4005_s16 = inlined_call_operand.vmem [shape: f32[2,1,128], index: 16, kind: input, shape index: {}]   ;;  %s4006_s17 = inlined_call_operand.vmem [shape: f32[2,128,32], index: 17, kind: input, shape index: {}]   ;;  %s4007_s18 = inlined_call_operand.vmem [shape: f32[2,9,32], index: 18, kind: input, shape index: {}]   ;;  %s4008_s19 = inlined_call_operand.vmem [shape: f32[2,2,32], index: 19, kind: input, shape index: {}]   ;;  %s4009_s20 = inlined_call_operand.vmem [shape: f32[32,128], index: 20, kind: input, shape index: {}]   ;;  %s4010_s21 = inlined_call_operand.vmem [shape: f32[1,128], index: 21, kind: input, shape index: {}]   ;;  %s4011_s22 = inlined_call_operand.hbm [shape: f32[2,8,128], index: 22, kind: output, shape index: {}]  }
   0x1   :  { %4039 = sst [smem:[#allocation35_spill]] %s3989_s0 }
   0x2   :  { %4040 = sst [smem:[#allocation36_spill]] %s3990_s1 }
   0x3   :  { %4041 = sst [smem:[#allocation37_spill]] %s3991_s2 }
   0x4   :  { %4042 = sst [smem:[#allocation38_spill]] %s3992_s3 }
   0x5   :  { %4043 = sst [smem:[#allocation39_spill]] %s3993_s4 }
   0x6   :  { %4044 = sst [smem:[#allocation40_spill]] %s3994_s5 }
   0x7   :  { %4045 = sst [smem:[#allocation41_spill]] %s3995_s6 }
   0x8   :  { %4046 = sst [smem:[#allocation42_spill]] %s3996_s7 }
   0x9   :  { %4047 = sst [smem:[#allocation43_spill]] %s3997_s8 }
   0xa   :  { %4048 = sst [smem:[#allocation44_spill]] %s3998_s9 }
   0xb   :  { %4049 = sst [smem:[#allocation45_spill]] %s3999_s10 }
   0xc   :  { %4050 = sst [smem:[#allocation46_spill]] %s4000_s11 }
   0xd   :  { %4051 = sst [smem:[#allocation47_spill]] %s4001_s12 }
   0xe   :  { %4052 = sst [smem:[#allocation48_spill]] %s4002_s13 }
   0xf   :  { %4053 = sst [smem:[#allocation49_spill]] %s4003_s14 }
  0x10   :  { %4054 = sst [smem:[#allocation50_spill]] %s4006_s17 }
  0x11   :  { %4055 = sst [smem:[#allocation51_spill]] %s4007_s18 }
  0x12   :  { %4056 = sst [smem:[#allocation52_spill]] %s4008_s19 }
  0x13   :  { %4057 = sst [smem:[#allocation53_spill]] %s4009_s20 }
  0x14   :  { %4058 = sst [smem:[#allocation54_spill]] %s4010_s21 }
  0x15   :  { %4059 = sst [smem:[#allocation55_spill]] %s4011_s22 }
  0x16   :  { %27 = vsyncpa [#allocation4], 0 }
  0x17   :  { %29 = vsyncpa [#allocation4 + $0x1], 0 }
  0x18   :  { %30 = vsyncpa [#allocation7], 0 }
  0x19   :  { %32 = vsyncpa [#allocation7 + $0x1], 0 }
  0x1a   :  { %33 = vsyncpa [#allocation5], 0 }
  0x1b   :  { %35 = vsyncpa [#allocation5 + $0x1], 0  ;;  %s3384_s3 = smov 0   ;;  %s3386_s28 = smov 0  }
  0x1c   :  { %s3388_s29 = smov 0   ;;  %s3390_s30 = smov 0  }
  0x1d   :  { %s3392_s4 = smov 0   ;;  %s3394_s0 = smov 0  }
  0x1e   :  { %s3396_s23 = smov 0   ;;  %s3398_s1 = smov 0  }
  0x1f   :  { %s3400_s5 = smov 0   ;;  %s3402_s24 = smov 0  }
  0x20   :  { %s3404_s6 = smov 0  }
  0x21 LB: > { %4060 = sst [smem:[#allocation12_spill]] %s3215_s3  ;;  %s2775_s25 = sadd.s32 4294967295, %s3255_s6   ;;  %s3255_s6 = sphi %s3404_s6, %s41_s6   ;;  %s3251_s24 = sphi %s3402_s24, %s4138_s24   ;;  %s3247_s5 = sphi %s3400_s5, %s4137_s5   ;;  %s3243_s1 = sphi %s3398_s1, %s4136_s1   ;;  %s3239_s23 = sphi %s3396_s23, %s4135_s23   ;;  %s3235_s0 = sphi %s3394_s0, %s4134_s0   ;;  %s3231_s4 = sphi %s3392_s4, %s4133_s4   ;;  %s3227_s30 = sphi %s3390_s30, %s4132_s30   ;;  %s3223_s29 = sphi %s3388_s29, %s4131_s29   ;;  %s3219_s28 = sphi %s3386_s28, %s4130_s28   ;;  %s3215_s3 = sphi %s3384_s3, %s4129_s3  }
  0x22   : > { %4061 = sst [smem:[#allocation13_spill]] %s3219_s28  ;;  %s2776_s26 = sadd.s32 4294967294, %s3255_s6  }
  0x23   : > { %4062 = sst [smem:[#allocation14_spill]] %s3223_s29  ;;  %s50_s2 = sadd.s32 1, %s3247_s5 }
  0x24   : > { %4063 = sst [smem:[#allocation15_spill]] %s3231_s4  ;;  %s53_s27 = sadd.s32 1, %s3251_s24 }
  0x25   : > { %4064 = sst [smem:[#allocation16_spill]] %s3235_s0  ;;  %p51_p0 = scmp.ge.s32.totalorder %s50_s2, 2 }
  0x26   : > { %4065 = sst [smem:[#allocation17_spill]] %s3239_s23  ;;  %s242_s22 = sadd.s32 1, %s3235_s0 }
  0x27   : > { %4066 = sst [smem:[#allocation18_spill]] %s3243_s1  ;;  %p249_p1 = scmp.ne.s32.totalorder %s3235_s0, %s3231_s4 }
  0x28   : > { %4067 = sst [smem:[#allocation19_spill]] %s3247_s5  ;;  %p250_p2 = scmp.eq.s32.totalorder %s3255_s6, 0 }
  0x29   : > { %4068 = sst [smem:[#allocation20_spill]] %s3251_s24  ;;  %s4140_s2 = smov (%p51_p0, %s50_s2), 0 }
  0x2a   : > { %4069 = sst [smem:[#allocation21_spill]] %s3255_s6  ;;  %s4142_s27 = smov (!%p51_p0, %s53_s27), %s3251_s24 }
  0x2b   : > { %4070 = sst [smem:[#allocation22_spill]] %s4140_s2  ;;  %s239_s21 = ssub.s32 %s3247_s5, %s4140_s2 }
  0x2c   : > { %p3450_p3 = por %p250_p2, %p249_p1  ;;  %p55_p4 = scmp.ge.s32.totalorder %s4142_s27, 2 }
  0x2d   : > { %p240_p5 = scmp.eq.s32.totalorder %s239_s21, 0  ;;  %p255_p6 = scmp.ne.s32.totalorder %s3231_s4, %s3227_s30 }
  0x2e   : > { %p256_p7 = scmp.eq.s32.totalorder %s2775_s25, 0  ;;  %s4144_s27 = smov (%p55_p4, %s4142_s27), 0 }
  0x2f   : > { %4072 = sst [smem:[#allocation23_spill]] %s4144_s27  ;;  %s619_s18 = ssub.s32 %s3251_s24, %s4144_s27 }
  0x30   : > { %s3458_s19 = scalar_select %p240_p5, %s3235_s0, %s242_s22  }
  0x31   : > { %p3460_p8 = por %p256_p7, %p255_p6  ;;  %p620_p9 = scmp.eq.s32.totalorder %s619_s18, 0 }
  0x32   : > { %4073 = sst [smem:[#allocation24_spill]] %s3458_s19  ;;  %s622_s17 = sadd.s32 1, %s3223_s29 }
  0x33   : > { %p632_p10 = scmp.ne.s32.totalorder %s3223_s29, %s3219_s28  ;;  %p633_p11 = scmp.eq.s32.totalorder %s2775_s25, 3 }
  0x34   : > { %s3470_s21 = scalar_select %p620_p9, %s3223_s29, %s622_s17  }
  0x35   : > { %p3472_p12 = por %p633_p11, %p632_p10  ;;  %p638_p13 = scmp.ne.s32.totalorder %s3219_s28, %s3215_s3 }
  0x36   : > { %4075 = sst [smem:[#allocation25_spill]] %s3470_s21  ;;  %p639_p0 = scmp.eq.s32.totalorder %s2776_s26, 3 }
  0x37   : > { %s4076_s30 = scalar_select %p3472_p12, 1, 0 }
  0x38   : > { %p2886_p1 = scmp.lt.s32.totalorder %s3255_s6, 4  ;;  %s718_s22 = sand.u32 1, %s3235_s0  }
  0x39   : > { %4077 = sst [smem:[#allocation26_spill]] %s4076_s30  ;;  %p3480_p2 = por %p639_p0, %p638_p13 }
  0x3a   : > { %s4080_s7 = sld [smem:[#allocation42_spill]]  ;;  %s721_s17 = scalar_lea.vmem [#allocation3], %s718_s22 }
  0x3b   : > { %s4078_s27 = scalar_select %p3480_p2, 1, 0 }
  0x3c   : > { %s728_s21 = sshll.u32 %s721_s17, 4  ;;  %p2876_p4 = pnand %p2886_p1, %p3450_p3  ;;  %s729_s21 = int_to_ptr.vmem [resolvable:$true] %s728_s21 }
  0x3d   : > { %4079 = sst [smem:[#allocation27_spill]] %s4078_s27  ;;  %p2779_p5 = scmp.ge.s32.totalorder %s3255_s6, 1 }
  0x3e   : > { %p834_p6 = scmp.lt.s32.totalorder %s3255_s6, 5  ;;  %s719_s26 = scalar_lea.sflag [#allocation4], %s718_s22 }
  0x3f   : > { %s4081_s13 = sld [smem:[#allocation48_spill]]  ;;  %s777_s30 = scalar_lea.vmem [#allocation6], %s718_s22 }
  0x40   : > { %s724_s25 = scalar_lea.hbm %s4080_s7, %s3247_s5  ;;  %p835_p7 = pnand %p2779_p5, %p834_p6 }
  0x41   : > { %s726_s19 = sshll.u32 %s724_s25, 4  ;;  %s784_s24 = sshll.u32 %s777_s30, 4  ;;  %s727_s19 = int_to_ptr.hbm [resolvable:$true] %s726_s19  ;;  %s785_s24 = int_to_ptr.vmem [resolvable:$true] %s784_s24 }
  0x42   : > { %2878 = dma.hbm_to_vmem [thread:$0]  (!%p2876_p4), %s727_s19, 16, %s729_s21, %s719_s26  }
  0x43   : > { %s775_s18 = scalar_lea.sflag [#allocation7], %s718_s22  ;;  %838 = sbr.rel (%p835_p7) target bundleno = 5249 (0x1481), region = 108 }
  0x45   : > { %s780_s27 = scalar_lea.hbm %s4081_s13, %s3247_s5 }
  0x46   : > { %s782_s3 = sshll.u32 %s780_s27, 4  ;;  %s783_s3 = int_to_ptr.hbm [resolvable:$true] %s782_s3 }
  0x47   : > { %2881 = dma.hbm_to_vmem [thread:$0]  (!%p2876_p4), %s783_s3, 16, %s785_s24, %s775_s18  }
  0x48   : > { %s3497_s20 = sand.u32 1, %s3231_s4  }
  0x49   : > { %4082 = sst [smem:[#allocation28_spill]] %s3497_s20  ;;  %s841_s19 = scalar_lea.sflag [#allocation4], %s3497_s20 }
  0x4a   : > { %3202 = dma.done.wait (%p3460_p8), %s841_s19, 16  }
  0x4b   : > { %3204 = vsyncadd (%p3460_p8), %s841_s19, 4294967280  ;;  %s850_s29 = scalar_lea.sflag [#allocation7], %s3497_s20 }
  0x4c   : > { %3206 = dma.done.wait (%p3460_p8), %s850_s29, 16  }
  0x4d   : > { %3208 = vsyncadd (%p3460_p8), %s850_s29, 4294967280  ;;  %s4023_s3 = sand.u32 1, %s3219_s28   ;;  %p1000_p3 = scmp.lt.s32.totalorder %s3243_s1, 1 }
  0x4e   : > { %s3515_s27 = sshll.u32 %s4023_s3, 3  ;;  %p1009_p9 = scmp.lt.s32.totalorder %s3239_s23, 1 }
  0x4f   : > { %s1001_s30 = scalar_select %p1000_p3, %s3243_s1, 1 }
  0x50   : > { %s3520_s22 = scalar_select %p1009_p9, %s3239_s23, 1 }
  0x51   : > { %s2781_s2 = sshll.u32 %s1001_s30, 3  ;;  %s2856_s25 = sshll.u32 %s1001_s30, 4 }
  0x52   : > { %s4083_s24 = sld [smem:[#allocation35_spill]]  ;;  %s2857_s21 = sshll.u32 %s3520_s22, 5 }
  0x53   : > { %s4084_s0 = sld [smem:[#allocation36_spill]]  ;;  %s2861_s5 = sshll.u32 %s3520_s22, 7 }
  0x54   : > { %s4087_s1 = sld [smem:[#allocation37_spill]]  ;;  %s2862_s28 = sshll.u32 %s3520_s22, 4 }
  0x55   : > { %s4088_s17 = sld [smem:[#allocation38_spill]]  ;;  %s2796_s26 = sshll.u32 %s3520_s22, 1 }
  0x56   : > { %s4090_s7 = sld [smem:[#allocation41_spill]]  ;;  %s1068_s29 = scalar_lea.vmem %s4005_s16, %s3520_s22 }
  0x57   : > { %s4092_s8 = sld [smem:[#allocation43_spill]] }
  0x58   : > { %s1003_s18 = scalar_lea.vmem %s4083_s24, %s2781_s2  ;;  %s4094_s9 = sld [smem:[#allocation44_spill]] }
  0x59   : > { %s3528_s3 = scalar_lea.vmem %s4084_s0, %s2856_s25  ;;  %s4089_s0 = sld [smem:[#allocation40_spill]] }
  0x5a   : > { %4085 = sst [smem:[#allocation29_spill]] %s3528_s3  ;;  %s3538_s20 = scalar_lea.vmem %s4087_s1, %s2857_s21 }
  0x5b   : > { %s3543_s2 = scalar_lea.vmem %s4088_s17, %s2857_s21  ;;  %s4095_s11 = sld [smem:[#allocation46_spill]] }
  0x5c   : > { %s3553_s13 = scalar_lea.vmem %s4090_s7, %s2857_s21  ;;  %s4097_s10 = sld [smem:[#allocation45_spill]] }
  0x5d   : > { %4091 = sst [smem:[#allocation30_spill]] %s3553_s13  ;;  %s3560_s4 = scalar_lea.vmem %s4092_s8, %s2861_s5 }
  0x5e   : > { %4093 = sst [smem:[#allocation31_spill]] %s3560_s4  ;;  %s3565_s17 = scalar_lea.vmem %s4094_s9, %s2862_s28 }
  0x5f   : > { %s3548_s25 = scalar_lea.vmem %s4089_s0, %s2857_s21  ;;  %s4098_s12 = sld [smem:[#allocation47_spill]] }
  0x60   : > { %s4100_s14 = sld [smem:[#allocation49_spill]]  ;;  %s3591_s24 = scalar_lea.vmem %s4004_s15, %s2857_s21 }
  0x61   : > { %s3571_s19 = scalar_lea.vmem %s4095_s11, %s2857_s21  ;;  %s999_s4 = scalar_lea.vmem [#allocation8], %s3515_s27 }
  0x62   : > { %4096 = sst [smem:[#allocation32_spill]] %s3571_s19  ;;  %s3576_s3 = scalar_lea.vmem %s4097_s10, %s2796_s26 }
  0x63   : > { %s4102_s19 = sld [smem:[#allocation50_spill]] }
  0x65   : > { %s3581_s6 = scalar_lea.vmem %s4098_s12, %s2857_s21 }
  0x66   : > { %4099 = sst [smem:[#allocation33_spill]] %s3581_s6  ;;  %s3586_s30 = scalar_lea.vmem %s4100_s14, %s2857_s21 }
  0x67   : > { %4101 = sst [smem:[#allocation34_spill]] %s3586_s30 }
  0x68   : > { %s4103_s6 = sld [smem:[#allocation51_spill]] }
  0x69   : > { %s3600_s13 = scalar_lea.vmem %s4102_s19, %s2861_s5  ;;  %s4104_s30 = sld [smem:[#allocation52_spill]] }
  0x6a   : > { %s4105_s21 = sld [smem:[#allocation17_spill]] }
  0x6e   : > { %s3605_s8 = scalar_lea.vmem %s4103_s6, %s2862_s28 }
  0x6f   : > { %s3610_s9 = scalar_lea.vmem %s4104_s30, %s2796_s26 }
  0x70   : > { %p2810_p8 = scmp.ne.s32.totalorder %s4105_s21, 0 }
  0x72   : > { %1086 = sbr.rel (%p2810_p8) target bundleno = 121 (0x79), region = 120 }
  0x77   : > { %v1087_v0 = vld [vmem:[%s1003_s18] sm:$0xff]  ;;  %vm1088_vm0 = vcmask 261120  }
  0x78   : > { %1089 = vst.msk [vmem:[#allocation2] sm:$0xff] %vm1088_vm0, %v1087_v0 }
  0x79 PF: > { %vm1093_vm1 = vcmask 261120   ;;  %v3257_v3 = vmov 32.0   ;;  %v3621_v23 = vld [vmem:[%s3565_s17] sm:$0xff]  ;;  %v1130_v37 = vld [vmem:[%s3538_s20 + $0x18] sm:$0xff]  ;;  %v1129_v39 = vld [vmem:[%s3538_s20 + $0x10] sm:$0xff]  ;;  %s4106_s12 = sld [smem:[#allocation39_spill]] }
  0x7a   : > { %3014 = vrcp.f32 %v3257_v3  ;;  %v1123_v25 = vperm.slane %v3621_v23, 0  ;;  %v1125_v28 = vperm.slane %v3621_v23, 1  ;;  %v1134_v38 = vld [vmem:[%s3543_s2 + $0x18] sm:$0xff]  ;;  %1208 = vmatpush.msra.mxu0 %v1130_v37  ;;  %v1133_v40 = vld [vmem:[%s3543_s2 + $0x10] sm:$0xff]  ;;  %v1128_v41 = vld [vmem:[%s3538_s20 + $0x8] sm:$0xff]  ;;  %v1184_v55 = vperm.slane %v3621_v23, 2 }
  0x7b   : > { %1234 = vmatpush.msra.mxu1 %v1134_v38  ;;  %v1132_v42 = vld [vmem:[%s3543_s2 + $0x8] sm:$0xff]  ;;  %v1127_v43 = vld [vmem:[%s3538_s20] sm:$0xff]  ;;  %v1186_v59 = vperm.slane %v3621_v23, 3  ;;  %v1192_v3 = vperm.slane %v3621_v23, 4  ;;  %vm1248_vm9 = vcmask 64512   ;;  %s3258_s20 = smov 120  }
  0x7c   : > { %1209 = vmatpush.msra.mxu0 %v1129_v39  ;;  %v1131_v44 = vld [vmem:[%s3543_s2] sm:$0xff]  ;;  %s3260_s18 = smov 112   ;;  %s3261_s2 = smov 104  }
  0x7d   : > { %1235 = vmatpush.msra.mxu1 %v1133_v40  ;;  %v1161_v53 = vld [vmem:[%s3576_s3] sm:$0x3]  ;;  %s3259_s3 = smov 96   ;;  %s3263_s5 = smov 80  }
  0x7e   : > { %1210 = vmatpush.msra.mxu0 %v1128_v41  ;;  %v1188_v56 = vperm.slane %v1161_v53, 0  ;;  %v1190_v60 = vperm.slane %v1161_v53, 1  ;;  %s3264_s28 = smov 88   ;;  %s3265_s26 = smov 72  }
  0x7f   : > { %v1090_v1 = vld [vmem:[#allocation2] sm:$0xff]  ;;  %1236 = vmatpush.msra.mxu1 %v1132_v42  ;;  %s4107_s14 = scalar_lea.vmem %s4106_s12, %s3520_s22  ;;  %s3266_s19 = smov 8  }
  0x80   : > { %v1094_v2 = vsel %vm1093_vm1, %v1090_v1, 0.0  ;;  %v3015_v4 = vpop.eup %3014  ;;  %1211 = vmatpush.msra.mxu0 %v1127_v43  ;;  %s3267_s6 = smov 16   ;;  %s3268_s30 = smov 24  }
  0x81   : > { %1095 = vadd.xlane.f32.xlu0 %v1094_v2  ;;  %v1098_v5 = vmul.f32 32.0, %v3015_v4  ;;  %vm1102_vm2 = vweird.f32 %v3015_v4  ;;  %1237 = vmatpush.msra.mxu1 %v1131_v44  ;;  %s4108_s0 = sld [smem:[#allocation30_spill]] }
  0x82   : > { %s4110_s7 = sld [smem:[#allocation28_spill]] }
  0x83   : > { %v1099_v6 = vsub.f32 1.0, %v1098_v5  ;;  %s4112_s23 = sld [smem:[#allocation29_spill]] }
  0x84   : > { %s4116_s10 = sld [smem:[#allocation34_spill]] }
  0x85   : > { %v1100_v7 = vmul.f32 %v3015_v4, %v1099_v6  ;;  %s4117_s22 = sld [smem:[#allocation17_spill]] }
  0x87   : > { %v1101_v8 = vadd.f32 %v3015_v4, %v1100_v7 }
  0x88   : > { %s4111_s1 = scalar_lea.vmem [#allocation3], %s4110_s7  ;;  %s4115_s21 = scalar_lea.vmem [#allocation6], %s4110_s7 }
  0x89   : > { %v3615_v9 = vsel %vm1102_vm2, %v3015_v4, %v1101_v8 }
  0x8b   : > { %p2850_p10 = scmp.ne.s32.totalorder %s4117_s22, 1 }
  0x8c   : > { %s4118_s12 = sld [smem:[#allocation53_spill]] (!%p2850_p10) }
  0xf4   : > { %v1096_v10 = vpop.xlane.xlu0 %1095 }
  0xf5   : > { %v1104_v11 = vmul.f32 %v3615_v9, %v1096_v10  ;;  %v1242_v10 = vlaneseq }
  0xf7   : > { %v1105_v12 = vsub.f32 %v1090_v1, %v1104_v11  ;;  %v3008_v1 = vld [vmem:[%s4107_s14] ss:$0 sm:$0xff]  ;;  %v1243_v11 = vshrl.u32 %v1242_v10, 7 }
  0xf9   : > { %v1106_v13 = vmul.f32 %v1105_v12, %v1105_v12 }
  0xfb   : > { %v1107_v14 = vsel %vm1093_vm1, %v1106_v13, 0.0 }
  0xfc   : > { %1108 = vadd.xlane.f32.xlu0 %v1107_v14 }
 0x16f   : > { %v1109_v15 = vpop.xlane.xlu0 %1108 }
 0x170   : > { %v1110_v16 = vmul.f32 %v1109_v15, %v3615_v9  ;;  %v3262_v15 = vmov 0.0  }
 0x172   : > { %v1111_v17 = vadd.f32 1e-05, %v1110_v16 }
 0x174   : > { %3016 = vrsqrt.f32 %v1111_v17  ;;  %vm1118_vm4 = vweird.f32 %v1111_v17 }
 0x17a   : > { %v3017_v18 = vpop.eup %3016 }
 0x17b   : > { %v1113_v19 = vmul.f32 %v3017_v18, %v1111_v17  ;;  %vm1119_vm3 = vweird.f32 %v3017_v18 }
 0x17c   : > { %vm1120_vm5 = vmor %vm1118_vm4, %vm1119_vm3 }
 0x17d   : > { %v1114_v20 = vmul.f32 %v3017_v18, %v1113_v19 }
 0x17f   : > { %v1115_v21 = vmul.f32 0.5, %v1114_v20 }
 0x181   : > { %v1116_v22 = vsub.f32 1.5, %v1115_v21 }
 0x183   : > { %v1117_v24 = vmul.f32 %v3017_v18, %v1116_v22 }
 0x185   : > { %v1121_v26 = vsel %vm1120_vm5, %v3017_v18, %v1117_v24 }
 0x186   : > { %v1122_v27 = vmul.f32 %v1121_v26, %v1105_v12  ;;  %v1245_v12 = vand.u32 127, %v1242_v10 }
 0x188   : > { %v1124_v29 = vmul.f32 %v1123_v25, %v1122_v27  ;;  %vm1246_vm10 = vcmp.gt.s32.totalorder %v1245_v12, %v1243_v11 }
 0x189   : > { %v1247_v16 = vsel %vm1246_vm10, -inf, %v3262_v15 }
 0x18a   : > { %v3625_v30 = vadd.f32 %v1125_v28, %v1124_v29 }
 0x18c   : > { %v1162_v31 = vsel %vm1093_vm1, %v3625_v30, 0.0 }
 0x18d   : > { %1163 = vadd.xlane.f32.xlu1 %v1162_v31 }
 0x200   : > { %v1164_v32 = vpop.xlane.xlu1 %1163 }
 0x201   : > { %v1165_v33 = vmul.f32 %v1164_v32, %v3615_v9 }
 0x203   : > { %v1166_v34 = vsub.f32 %v3625_v30, %v1165_v33 }
 0x205   : > { %v1167_v35 = vmul.f32 %v1166_v34, %v1166_v34 }
 0x207   : > { %v1168_v36 = vsel %vm1093_vm1, %v1167_v35, 0.0 }
 0x208   : > { %1169 = vadd.xlane.f32.xlu1 %v1168_v36 }
 0x27b   : > { %v1170_v45 = vpop.xlane.xlu1 %1169 }
 0x27c   : > { %v1171_v46 = vmul.f32 %v1170_v45, %v3615_v9 }
 0x27e   : > { %v1172_v47 = vadd.f32 1e-05, %v1171_v46 }
 0x280   : > { %3018 = vrsqrt.f32 %v1172_v47  ;;  %vm1179_vm7 = vweird.f32 %v1172_v47 }
 0x286   : > { %v3019_v48 = vpop.eup %3018 }
 0x287   : > { %v1174_v49 = vmul.f32 %v3019_v48, %v1172_v47  ;;  %vm1180_vm6 = vweird.f32 %v3019_v48 }
 0x288   : > { %vm1181_vm8 = vmor %vm1179_vm7, %vm1180_vm6 }
 0x289   : > { %v1175_v50 = vmul.f32 %v3019_v48, %v1174_v49 }
 0x28b   : > { %v1176_v51 = vmul.f32 0.5, %v1175_v50 }
 0x28d   : > { %v1177_v52 = vsub.f32 1.5, %v1176_v51 }
 0x28f   : > { %v1178_v54 = vmul.f32 %v3019_v48, %v1177_v52 }
 0x291   : > { %v1182_v57 = vsel %vm1181_vm8, %v3019_v48, %v1178_v54 }
 0x292   : > { %v1183_v58 = vmul.f32 %v1182_v57, %v1166_v34 }
 0x294   : > { %v1185_v61 = vmul.f32 %v1184_v55, %v1183_v58  ;;  %v1189_v62 = vmul.f32 %v1188_v56, %v1183_v58 }
 0x296   : > { %v1187_v63 = vadd.f32 %v1186_v59, %v1185_v61  ;;  %v1191_v0 = vadd.f32 %v1190_v60, %v1189_v62 }
 0x298   : > { %2811 = vmatmul.msk.f32.vlgmr.msra.gmra.mxu0 %vm1093_vm1, %v1187_v63  ;;  %2812 = vmatmul.msk.f32.vlgmr.msra.gmra.mxu1 %vm1093_vm1, %v1191_v0 }
 0x315   : > { %v1239_v2 = vpop.f32.mrf.mxu1  ;;  %v1213_v5 = vpop.f32.mrf.mxu0 }
 0x316   : > { %v3652_v4 = vadd.f32 %v3008_v1, %v1239_v2  ;;  %v1214_v6 = vadd.f32 %v1213_v5, %v1192_v3 }
 0x318   : > { %1327 = vrot.lane.b32.xlu1 %v3652_v4, %s3258_s20  ;;  %1299 = vrot.lane.b32.xlu0 %v3652_v4, %s3259_s3 }
 0x319   : > { %2813 = vmatpush.xpose.msk.msrb.mxu0 %vm1248_vm9, %v3652_v4 }
 0x31c   : > { %2814 = vmatmul.msk.f32.vlgmr.msrb.gmra.mxu0 %vm1248_vm9, %v1214_v6 }
 0x320   : > { %1405 = vrot.lane.b32.xlu1 %v3652_v4, %s3260_s18  ;;  %1483 = vrot.lane.b32.xlu0 %v3652_v4, %s3261_s2 }
 0x328   : > { %1403 = vrot.lane.b32.xlu0 %v1214_v6, %s3260_s18 }
 0x38a   : > { %v1328_v7 = vpop.permute.xlu1 %1327  ;;  %v1300_v8 = vpop.permute.xlu0 %1299 }
 0x38b   : > { %1320 = vmatpush.msra.mxu3 %v1300_v8 }
 0x38d   : > { %2816 = vmatpush.xpose.msk.msrb.mxu3 %vm1248_vm9, %v1328_v7 }
 0x392   : > { %v1406_v13 = vpop.permute.xlu1 %1405  ;;  %v1484_v14 = vpop.permute.xlu0 %1483 }
 0x393   : > { %2819 = vmatpush.xpose.msk.msra.mxu0 %vm1248_vm9, %v1406_v13 }
 0x399   : > { %v1272_v17 = vpop.f32.mrf.mxu0 }
 0x39a   : > { %v1273_v18 = vadd.f32 %v1272_v17, %v1247_v16  ;;  %v1404_v19 = vpop.permute.xlu0 %1403 }
 0x39b   : > { %2820 = vmatmul.msk.f32.vlgmr.msra.gmra.mxu0 %vm1248_vm9, %v1404_v19 }
 0x39c   : > { %v1275_v20 = vsel %vm1248_vm9, %v1273_v18, -inf }
 0x39d   : > { %1276 = vmax.xlane.f32.xlu2 %v1275_v20 }
 0x3b5   : > { %1325 = vrot.lane.b32.xlu2 %v1214_v6, %s3258_s20 }
 0x410   : > { %v1277_v21 = vpop.xlane.xlu2 %1276 }
 0x411   : > { %v1278_v22 = vsub.f32 %v1273_v18, %v1277_v21 }
 0x413   : > { %v1279_v24 = vmul.f32 1.442695, %v1278_v22 }
 0x415   : > { %3020 = vpow2.f32 %v1279_v24 }
 0x418   : > { %v1428_v25 = vpop.f32.mrf.mxu0  ;;  %v1326_v31 = vpop.permute.xlu2 %1325 }
 0x419   : > { %v1429_v26 = vadd.f32 %v1428_v25, %v1247_v16 }
 0x41b   : > { %v3021_v27 = vpop.eup %3020  ;;  %v1431_v28 = vsel %vm1248_vm9, %v1429_v26, -inf }
 0x41c   : > { %1432 = vmax.xlane.f32.xlu0 %v1431_v28  ;;  %v1281_v29 = vsel %vm1248_vm9, %v3021_v27, 0.0 }
 0x41d   : > { %1282 = vadd.xlane.f32.xlu2 %v1281_v29 }
 0x435   : > { %1481 = vrot.lane.b32.xlu2 %v1214_v6, %s3261_s2 }
 0x48f   : > { %v1433_v32 = vpop.xlane.xlu0 %1432 }
 0x490   : > { %v1434_v33 = vsub.f32 %v1429_v26, %v1433_v32  ;;  %v1283_v34 = vpop.xlane.xlu2 %1282 }
 0x491   : > { %3022 = vrcp.f32 %v1283_v34  ;;  %v1295_v40 = vand.u32 2147483648, %v1283_v34  ;;  %v1293_v43 = vand.u32 2147483647, %v1283_v34  ;;  %vm1289_vm12 = vweird.f32 %v1283_v34 }
 0x492   : > { %v1435_v35 = vmul.f32 1.442695, %v1434_v33 }
 0x493   : > { %v1296_v45 = vor.u32 1.1754944e-38, %v1295_v40  ;;  %vm1294_vm14 = vcmp.eq.f32.partialorder %v1293_v43, 8.507059e+37 }
 0x494   : > { %3024 = vpow2.f32 %v1435_v35 }
 0x497   : > { %v3023_v36 = vpop.eup %3022 }
 0x498   : > { %v1285_v37 = vmul.f32 %v3023_v36, %v1283_v34  ;;  %vm1290_vm11 = vweird.f32 %v3023_v36  ;;  %v1482_v49 = vpop.permute.xlu2 %1481 }
 0x499   : > { %vm1291_vm13 = vmor %vm1289_vm12, %vm1290_vm11 }
 0x49a   : > { %v3674_v38 = vpop.eup %3024  ;;  %v1286_v39 = vsub.f32 1.0, %v1285_v37 }
 0x49b   : > { %v1437_v41 = vsel %vm1248_vm9, %v3674_v38, 0.0 }
 0x49c   : > { %v1287_v42 = vmul.f32 %v3023_v36, %v1286_v39  ;;  %1438 = vadd.xlane.f32.xlu0 %v1437_v41 }
 0x49e   : > { %v1288_v44 = vadd.f32 %v3023_v36, %v1287_v42 }
 0x4a0   : > { %v1292_v46 = vsel %vm1291_vm13, %v3023_v36, %v1288_v44  ;;  %vm1572_vm13 = vcmask 130048  }
 0x4a1   : > { %v1297_v47 = vsel %vm1294_vm14, %v1296_v45, %v1292_v46  ;;  %vm1574_vm14 = vcmask 195584  }
 0x4a2   : > { %v1298_v48 = vmul.f32 %v3021_v27, %v1297_v47 }
 0x4a4   : > { %2815 = vmatmul.msk.f32.vlgmr.msra.gmra.mxu3 %vm1248_vm9, %v1298_v48  ;;  %v1139_v48 = vld [vmem:[%s3548_s25 + $0x18] sm:$0xff] }
 0x4a5   : > { %2822 = vmatpush.xpose.msk.msra.mxu3 %vm1248_vm9, %v1484_v14  ;;  %1592 = vmatpush.msrb.mxu0 %v1139_v48 }
 0x4ac   : > { %2817 = vmatmul.msk.f32.vlgmr.msrb.gmra.mxu3 %vm1248_vm9, %v1326_v31 }
 0x4b0   : > { %1455 = vrot.lane.b32.xlu0 %v3652_v4, %s3263_s5 }
 0x4b4   : > { %2823 = vmatmul.msk.f32.vlgmr.msra.gmra.mxu3 %vm1248_vm9, %v1482_v49  ;;  %v1138_v49 = vld [vmem:[%s3548_s25 + $0x10] sm:$0xff] }
 0x4b5   : > { %1593 = vmatpush.msrb.mxu0 %v1138_v49 }
 0x50f   : > { %v1439_v3 = vpop.xlane.xlu0 %1438 }
 0x510   : > { %v1451_v26 = vand.u32 2147483648, %v1439_v3  ;;  %vm1445_vm5 = vweird.f32 %v1439_v3  ;;  %v1449_v28 = vand.u32 2147483647, %v1439_v3 }
 0x512   : > { %v1452_v34 = vor.u32 1.1754944e-38, %v1451_v26  ;;  %vm1450_vm7 = vcmp.eq.f32.partialorder %v1449_v28, 8.507059e+37  ;;  %v3009_v28 = vld [vmem:[%s4111_s1] ss:$0 sm:$0xff] }
 0x522   : > { %v1456_v14 = vpop.permute.xlu0 %1455 }
 0x527   : > { %v3684_v50 = vpop.f32.mrf.mxu3 }
 0x52f   : > { %v1350_v51 = vpop.f32.mrf.mxu3 }
 0x530   : > { %v1351_v52 = vadd.f32 %v1350_v51, %v1247_v16  ;;  %v1137_v51 = vld [vmem:[%s3548_s25 + $0x8] sm:$0xff] }
 0x531   : > { %1594 = vmatpush.msrb.mxu0 %v1137_v51 }
 0x532   : > { %v1353_v53 = vsel %vm1248_vm9, %v1351_v52, -inf }
 0x533   : > { %1354 = vmax.xlane.f32.xlu2 %v1353_v53 }
 0x537   : > { %v1506_v54 = vpop.f32.mrf.mxu3 }
 0x538   : > { %v1507_v55 = vadd.f32 %v1506_v54, %v1247_v16 }
 0x53a   : > { %v1509_v56 = vsel %vm1248_vm9, %v1507_v55, -inf }
 0x53b   : > { %1510 = vmax.xlane.f32.xlu1 %v1509_v56 }
 0x5a6   : > { %v1355_v57 = vpop.xlane.xlu2 %1354 }
 0x5a7   : > { %v1356_v58 = vsub.f32 %v1351_v52, %v1355_v57  ;;  %v1136_v52 = vld [vmem:[%s3548_s25] sm:$0xff]  ;;  %s4109_s25 = sld [smem:[#allocation31_spill]] }
 0x5a8   : > { %1595 = vmatpush.msrb.mxu0 %v1136_v52 }
 0x5a9   : > { %v1357_v59 = vmul.f32 1.442695, %v1356_v58 }
 0x5ab   : > { %3026 = vpow2.f32 %v1357_v59  ;;  %v1576_v59 = vperm.slane %v3621_v23, 5 }
 0x5ad   : > { %v1159_v26 = vld [vmem:[%s4109_s25 + $0x70] sm:$0xff]  ;;  %v1149_v48 = vld [vmem:[%s4109_s25 + $0x20] sm:$0xff]  ;;  %v1148_v51 = vld [vmem:[%s4109_s25 + $0x18] sm:$0xff] }
 0x5ae   : > { %v1511_v60 = vpop.xlane.xlu1 %1510 }
 0x5af   : > { %v1512_v61 = vsub.f32 %v1507_v55, %v1511_v60 }
 0x5b1   : > { %v3027_v62 = vpop.eup %3026  ;;  %v1513_v63 = vmul.f32 1.442695, %v1512_v61 }
 0x5b2   : > { %v1359_v0 = vsel %vm1248_vm9, %v3027_v62, 0.0 }
 0x5b3   : > { %3028 = vpow2.f32 %v1513_v63  ;;  %1360 = vadd.xlane.f32.xlu2 %v1359_v0 }
 0x5b4   : > { %3030 = vrcp.f32 %v1439_v3 }
 0x5b9   : > { %v3689_v1 = vpop.eup %3028 }
 0x5ba   : > { %v1515_v2 = vsel %vm1248_vm9, %v3689_v1, 0.0  ;;  %v3031_v6 = vpop.eup %3030 }
 0x5bb   : > { %1516 = vadd.xlane.f32.xlu1 %v1515_v2  ;;  %v1441_v7 = vmul.f32 %v3031_v6, %v1439_v3  ;;  %vm1446_vm2 = vweird.f32 %v3031_v6 }
 0x5bc   : > { %vm1447_vm6 = vmor %vm1445_vm5, %vm1446_vm2 }
 0x5bd   : > { %v1442_v10 = vsub.f32 1.0, %v1441_v7  ;;  %v1141_v7 = vld [vmem:[%s4108_s0 + $0x8] sm:$0xff] }
 0x5bf   : > { %v1443_v17 = vmul.f32 %v3031_v6, %v1442_v10 }
 0x5c1   : > { %v1444_v22 = vadd.f32 %v3031_v6, %v1443_v17 }
 0x5c3   : > { %v1448_v32 = vsel %vm1447_vm6, %v3031_v6, %v1444_v22  ;;  %v1142_v6 = vld [vmem:[%s4108_s0 + $0x10] sm:$0xff] }
 0x5c4   : > { %v1453_v36 = vsel %vm1450_vm7, %v1452_v34, %v1448_v32 }
 0x5c5   : > { %v1454_v40 = vmul.f32 %v3674_v38, %v1453_v36 }
 0x5cb   : > { %1377 = vrot.lane.b32.xlu2 %v3652_v4, %s3264_s28 }
 0x5d4   : > { %1533 = vrot.lane.b32.xlu1 %v3652_v4, %s3265_s26 }
 0x626   : > { %v1361_v5 = vpop.xlane.xlu2 %1360 }
 0x627   : > { %3032 = vrcp.f32 %v1361_v5  ;;  %v1373_v16 = vand.u32 2147483648, %v1361_v5  ;;  %v1371_v4 = vand.u32 2147483647, %v1361_v5  ;;  %vm1367_vm0 = vweird.f32 %v1361_v5 }
 0x629   : > { %v1374_v21 = vor.u32 1.1754944e-38, %v1373_v16  ;;  %vm1372_vm4 = vcmp.eq.f32.partialorder %v1371_v4, 8.507059e+37  ;;  %v1623_v4 = vperm.slane %v3621_v23, 6 }
 0x62d   : > { %v3033_v8 = vpop.eup %3032 }
 0x62e   : > { %v1363_v11 = vmul.f32 %v3033_v8, %v1361_v5  ;;  %v1517_v12 = vpop.xlane.xlu1 %1516  ;;  %v1378_v13 = vpop.permute.xlu2 %1377  ;;  %vm1368_vm15 = vweird.f32 %v3033_v8  ;;  %v1143_v5 = vld [vmem:[%s4108_s0 + $0x18] sm:$0xff] }
 0x62f   : > { %3034 = vrcp.f32 %v1517_v12  ;;  %1398 = vmatpush.msrb.mxu1 %v1378_v13  ;;  %vm1369_vm3 = vmor %vm1367_vm0, %vm1368_vm15  ;;  %v1529_v37 = vand.u32 2147483648, %v1517_v12  ;;  %vm1523_vm10 = vweird.f32 %v1517_v12  ;;  %v1527_v39 = vand.u32 2147483647, %v1517_v12 }
 0x630   : > { %v1364_v15 = vsub.f32 1.0, %v1363_v11 }
 0x631   : > { %1476 = vmatpush.msra.mxu1 %v1456_v14  ;;  %v1530_v42 = vor.u32 1.1754944e-38, %v1529_v37  ;;  %vm1528_vm12 = vcmp.eq.f32.partialorder %v1527_v39, 8.507059e+37  ;;  %v1153_v37 = vld [vmem:[%s4109_s25 + $0x40] sm:$0xff] }
 0x632   : > { %v1365_v18 = vmul.f32 %v3033_v8, %v1364_v15 }
 0x634   : > { %v1366_v19 = vadd.f32 %v3033_v8, %v1365_v18 }
 0x635   : > { %v3035_v20 = vpop.eup %3034 }
 0x636   : > { %v1519_v24 = vmul.f32 %v3035_v20, %v1517_v12  ;;  %v1370_v25 = vsel %vm1369_vm3, %v3033_v8, %v1366_v19  ;;  %vm1524_vm8 = vweird.f32 %v3035_v20  ;;  %v1140_v8 = vld [vmem:[%s4108_s0] sm:$0xff] }
 0x637   : > { %v1375_v27 = vsel %vm1372_vm4, %v1374_v21, %v1370_v25  ;;  %vm1525_vm11 = vmor %vm1523_vm10, %vm1524_vm8  ;;  %v1625_v21 = vperm.slane %v3621_v23, 7  ;;  %v1160_v25 = vld [vmem:[%s4109_s25 + $0x78] sm:$0xff] }
 0x638   : > { %v1520_v29 = vsub.f32 1.0, %v1519_v24  ;;  %v1376_v31 = vmul.f32 %v3027_v62, %v1375_v27  ;;  %1697 = vmatpush.msrb.mxu3 %v1160_v25  ;;  %v1158_v27 = vld [vmem:[%s4109_s25 + $0x68] sm:$0xff] }
 0x63a   : > { %v1521_v33 = vmul.f32 %v3035_v20, %v1520_v29  ;;  %2818 = vmatmul.msk.f32.vlgmr.msrb.gmra.mxu1 %vm1248_vm9, %v1376_v31  ;;  %1698 = vmatpush.msrb.mxu3 %v1159_v26  ;;  %v1157_v29 = vld [vmem:[%s4109_s25 + $0x60] sm:$0xff]  ;;  %v1156_v31 = vld [vmem:[%s4109_s25 + $0x58] sm:$0xff] }
 0x63b   : > { %1645 = vmatpush.msrb.mxu1 %v1143_v5 }
 0x63c   : > { %v1522_v35 = vadd.f32 %v3035_v20, %v1521_v33  ;;  %1699 = vmatpush.msrb.mxu3 %v1158_v27  ;;  %v1155_v33 = vld [vmem:[%s4109_s25 + $0x50] sm:$0xff] }
 0x63d   : > { %1646 = vmatpush.msrb.mxu1 %v1142_v6 }
 0x63e   : > { %v1526_v41 = vsel %vm1525_vm11, %v3035_v20, %v1522_v35  ;;  %1700 = vmatpush.msrb.mxu3 %v1157_v29  ;;  %v1154_v35 = vld [vmem:[%s4109_s25 + $0x48] sm:$0xff] }
 0x63f   : > { %v1531_v43 = vsel %vm1528_vm12, %v1530_v42, %v1526_v41  ;;  %1647 = vmatpush.msrb.mxu1 %v1141_v7 }
 0x640   : > { %v1532_v45 = vmul.f32 %v3689_v1, %v1531_v43  ;;  %1701 = vmatpush.msrb.mxu3 %v1156_v31  ;;  %v1151_v43 = vld [vmem:[%s4109_s25 + $0x30] sm:$0xff]  ;;  %v1750_v31 = vld [vmem:[%s4112_s23 + $0x8] sm:$0xff] }
 0x641   : > { %1648 = vmatpush.msrb.mxu1 %v1140_v8 }
 0x642   : > { %2821 = vmatmul.msk.f32.vlgmr.msra.gmra.mxu1 %vm1248_vm9, %v1454_v40  ;;  %1702 = vmatpush.msrb.mxu3 %v1155_v33  ;;  %v1152_v40 = vld [vmem:[%s4109_s25 + $0x38] sm:$0xff] }
 0x644   : > { %1703 = vmatpush.msrb.mxu3 %v1154_v35 }
 0x646   : > { %v1534_v44 = vpop.permute.xlu1 %1533  ;;  %1704 = vmatpush.msrb.mxu3 %v1153_v37 }
 0x647   : > { %1554 = vmatpush.msra.mxu2 %v1534_v44 }
 0x648   : > { %2824 = vmatmul.msk.f32.vlgmr.msra.gmra.mxu2 %vm1248_vm9, %v1532_v45  ;;  %1705 = vmatpush.msrb.mxu3 %v1152_v40 }
 0x64a   : > { %1706 = vmatpush.msrb.mxu3 %v1151_v43 }
 0x6b7   : > { %v1400_v46 = vpop.f32.mrf.mxu1 }
 0x6b8   : > { %1560 = vrot.lane.b32.xlu2 %v1400_v46, %s3266_s19  ;;  %v1150_v46 = vld [vmem:[%s4109_s25 + $0x28] sm:$0xff] }
 0x6b9   : > { %1707 = vmatpush.msrb.mxu3 %v1150_v46 }
 0x6bb   : > { %1708 = vmatpush.msrb.mxu3 %v1149_v48 }
 0x6bd   : > { %1709 = vmatpush.msrb.mxu3 %v1148_v51 }
 0x6bf   : > { %v1478_v38 = vpop.f32.mrf.mxu1 }
 0x6c0   : > { %1564 = vrot.lane.b32.xlu0 %v1478_v38, %s3267_s6 }
 0x6cb   : > { %v1556_v47 = vpop.f32.mrf.mxu2 }
 0x6cc   : > { %1568 = vrot.lane.b32.xlu1 %v1556_v47, %s3268_s30 }
 0x712   : > { %v1561_v53 = vpop.permute.xlu2 %1560 }
 0x713   : > { %v1571_v55 = vsel %vm1248_vm9, %v3684_v50, %v1561_v53 }
 0x732   : > { %v1565_v54 = vpop.permute.xlu0 %1564 }
 0x733   : > { %v1573_v56 = vsel %vm1572_vm13, %v1571_v55, %v1565_v54  ;;  %v1147_v54 = vld [vmem:[%s4109_s25 + $0x10] sm:$0xff] }
 0x734   : > { %1710 = vmatpush.msrb.mxu3 %v1147_v54 }
 0x73e   : > { %v1569_v57 = vpop.permute.xlu1 %1568 }
 0x73f   : > { %v1575_v58 = vsel %vm1574_vm14, %v1573_v56, %v1569_v57  ;;  %v1146_v56 = vld [vmem:[%s4109_s25 + $0x8] sm:$0xff] }
 0x740   : > { %2825 = vmatmul.msk.f32.vlgmr.msrb.gmra.mxu0 %vm1093_vm1, %v1575_v58  ;;  %1711 = vmatpush.msrb.mxu3 %v1146_v56  ;;  %v1145_v58 = vld [vmem:[%s4109_s25] sm:$0xff] }
 0x742   : > { %1712 = vmatpush.msrb.mxu3 %v1145_v58 }
 0x7bd   : > { %v1597_v60 = vpop.f32.mrf.mxu0 }
 0x7be   : > { %v1598_v61 = vadd.f32 %v1597_v60, %v1576_v59 }
 0x7c0   : > { %v3716_v62 = vadd.f32 %v1598_v61, %v3625_v30 }
 0x7c2   : > { %v1601_v50 = vsel %vm1093_vm1, %v3716_v62, 0.0 }
 0x7c3   : > { %1602 = vadd.xlane.f32.xlu2 %v1601_v50 }
 0x836   : > { %v1603_v63 = vpop.xlane.xlu2 %1602 }
 0x837   : > { %v1604_v0 = vmul.f32 %v1603_v63, %v3615_v9 }
 0x839   : > { %v1605_v1 = vsub.f32 %v3716_v62, %v1604_v0 }
 0x83b   : > { %v1606_v2 = vmul.f32 %v1605_v1, %v1605_v1 }
 0x83d   : > { %v1607_v3 = vsel %vm1093_vm1, %v1606_v2, 0.0 }
 0x83e   : > { %1608 = vadd.xlane.f32.xlu0 %v1607_v3 }
 0x8b1   : > { %v1609_v10 = vpop.xlane.xlu0 %1608 }
 0x8b2   : > { %v1610_v11 = vmul.f32 %v1609_v10, %v3615_v9 }
 0x8b4   : > { %v1611_v12 = vadd.f32 1e-05, %v1610_v11 }
 0x8b6   : > { %3036 = vrsqrt.f32 %v1611_v12  ;;  %vm1618_vm0 = vweird.f32 %v1611_v12 }
 0x8bc   : > { %v3037_v13 = vpop.eup %3036 }
 0x8bd   : > { %v1613_v14 = vmul.f32 %v3037_v13, %v1611_v12  ;;  %vm1619_vm15 = vweird.f32 %v3037_v13 }
 0x8be   : > { %vm1620_vm2 = vmor %vm1618_vm0, %vm1619_vm15 }
 0x8bf   : > { %v1614_v15 = vmul.f32 %v3037_v13, %v1613_v14 }
 0x8c1   : > { %v1615_v16 = vmul.f32 0.5, %v1614_v15 }
 0x8c3   : > { %v1616_v17 = vsub.f32 1.5, %v1615_v16 }
 0x8c5   : > { %v1617_v18 = vmul.f32 %v3037_v13, %v1616_v17 }
 0x8c7   : > { %v1621_v19 = vsel %vm1620_vm2, %v3037_v13, %v1617_v18 }
 0x8c8   : > { %v1622_v20 = vmul.f32 %v1621_v19, %v1605_v1 }
 0x8ca   : > { %v1624_v22 = vmul.f32 %v1623_v4, %v1622_v20 }
 0x8cc   : > { %v1626_v24 = vadd.f32 %v1625_v21, %v1624_v22  ;;  %v1749_v21 = vld [vmem:[%s4112_s23] sm:$0xff] }
 0x8cd   : > { %v1812_v22 = vsel %vm1093_vm1, %v1749_v21, 0.0 }
 0x8ce   : > { %2826 = vmatmul.msk.f32.vlgmr.msrb.gmra.mxu1 %vm1093_vm1, %v1626_v24  ;;  %1813 = vadd.xlane.f32.xlu0 %v1812_v22  ;;  %v3010_v24 = vld [vmem:[%s3565_s17 + $0x8] ss:$0 sm:$0xff]  ;;  %s4113_s17 = sld [smem:[#allocation33_spill]] }
 0x8d4   : > { %v1756_v51 = vld [vmem:[%s4113_s17 + $0x8] sm:$0xff]  ;;  %v1755_v54 = vld [vmem:[%s4113_s17] sm:$0xff] }
 0x94b   : > { %v1650_v23 = vpop.f32.mrf.mxu1 }
 0x94c   : > { %v3738_v32 = vadd.f32 %v3009_v28, %v1650_v23  ;;  %v1815_v23 = vsel %vm1093_vm1, %v1750_v31, 0.0 }
 0x94e   : > { %v1654_v34 = vmul.f32 0.70710677, %v3738_v32  ;;  %v1653_v4 = vmul.f32 0.5, %v3738_v32  ;;  %v1814_v32 = vpop.xlane.xlu0 %1813 }
 0x94f   : > { %v1818_v33 = vmul.f32 %v1814_v32, %v3615_v9 }
 0x950   : > { %v1655_v36 = vmul.f32 %v1654_v34, %v1654_v34 }
 0x952   : > { %v1656_v39 = vmin.f32 %v1655_v36, 16.0 }
 0x954   : > { %v1657_v41 = vmul.f32 2.1237322e-06, %v1656_v39  ;;  %v1668_v42 = vmul.f32 3.8918573e-05, %v1656_v39 }
 0x956   : > { %v1658_v44 = vadd.f32 0.00028619796, %v1657_v41  ;;  %v1669_v45 = vadd.f32 0.001143296, %v1668_v42 }
 0x958   : > { %v1659_v38 = vmul.f32 %v1658_v44, %v1656_v39  ;;  %v1670_v47 = vmul.f32 %v1669_v45, %v1656_v39 }
 0x95a   : > { %v1671_v49 = vadd.f32 0.014752088, %v1670_v47  ;;  %v1660_v52 = vadd.f32 0.0036580483, %v1659_v38  ;;  %v1758_v38 = vld [vmem:[%s4113_s17 + $0x18] sm:$0xff]  ;;  %v1757_v47 = vld [vmem:[%s4113_s17 + $0x10] sm:$0xff] }
 0x95b   : > { %1907 = vmatpush.msra.mxu0 %v1758_v38 }
 0x95c   : > { %v1672_v53 = vmul.f32 %v1671_v49, %v1656_v39  ;;  %v1661_v57 = vmul.f32 %v1660_v52, %v1656_v39 }
 0x95d   : > { %1908 = vmatpush.msra.mxu0 %v1757_v47 }
 0x95e   : > { %v1673_v55 = vadd.f32 0.112945676, %v1672_v53  ;;  %v1662_v61 = vadd.f32 0.05243302, %v1661_v57 }
 0x95f   : > { %1909 = vmatpush.msra.mxu0 %v1756_v51 }
 0x960   : > { %v1674_v59 = vmul.f32 %v1673_v55, %v1656_v39  ;;  %v1663_v0 = vmul.f32 %v1662_v61, %v1656_v39 }
 0x961   : > { %1910 = vmatpush.msra.mxu0 %v1755_v54 }
 0x962   : > { %v1675_v60 = vadd.f32 0.4994258, %v1674_v59  ;;  %v1664_v1 = vadd.f32 0.18741608, %v1663_v0 }
 0x964   : > { %v1676_v50 = vmul.f32 %v1675_v60, %v1656_v39  ;;  %v1665_v3 = vmul.f32 %v1664_v1, %v1656_v39 }
 0x966   : > { %v1677_v63 = vadd.f32 1.0, %v1676_v50  ;;  %v1666_v8 = vadd.f32 1.1283791, %v1665_v3  ;;  %v1785_v3 = vld [vmem:[%s3610_s9] sm:$0x3]  ;;  %s4114_s9 = sld [smem:[#allocation32_spill]] }
 0x968   : > { %3038 = vrcp.f32 %v1677_v63  ;;  %v1689_v7 = vand.u32 2147483648, %v1677_v63  ;;  %v1687_v11 = vand.u32 2147483647, %v1677_v63  ;;  %vm1683_vm4 = vweird.f32 %v1677_v63 }
 0x969   : > { %v1667_v14 = vmul.f32 %v1666_v8, %v1654_v34  ;;  %v1820_v34 = vsub.f32 %v1749_v21, %v1818_v33 }
 0x96a   : > { %v1690_v13 = vor.u32 1.1754944e-38, %v1689_v7  ;;  %vm1688_vm6 = vcmp.eq.f32.partialorder %v1687_v11, 8.507059e+37  ;;  %v3780_v7 = vld [vmem:[%s3605_s8] sm:$0xff]  ;;  %v1856_v11 = vperm.slane %v1785_v3, 0 }
 0x96b   : > { %v1822_v35 = vmul.f32 %v1820_v34, %v1820_v34 }
 0x96d   : > { %v1824_v36 = vsel %vm1093_vm1, %v1822_v35, 0.0 }
 0x96e   : > { %v3039_v2 = vpop.eup %3038  ;;  %1825 = vadd.xlane.f32.xlu0 %v1824_v36 }
 0x96f   : > { %v1679_v5 = vmul.f32 %v3039_v2, %v1677_v63  ;;  %vm1684_vm3 = vweird.f32 %v3039_v2 }
 0x970   : > { %vm1685_vm5 = vmor %vm1683_vm4, %vm1684_vm3 }
 0x971   : > { %v1680_v6 = vsub.f32 1.0, %v1679_v5 }
 0x973   : > { %v1681_v10 = vmul.f32 %v3039_v2, %v1680_v6 }
 0x975   : > { %v1682_v12 = vadd.f32 %v3039_v2, %v1681_v10 }
 0x977   : > { %v1686_v15 = vsel %vm1685_vm5, %v3039_v2, %v1682_v12 }
 0x978   : > { %v1691_v16 = vsel %vm1688_vm6, %v1690_v13, %v1686_v15  ;;  %v1745_v15 = vperm.slane %v3780_v7, 0 }
 0x979   : > { %v1692_v17 = vmul.f32 %v1691_v16, %v1667_v14 }
 0x97b   : > { %v2827_v18 = vclamps-f32 %v1692_v17, 1.0  ;;  %v1859_v17 = vperm.slane %v1785_v3, 1 }
 0x97d   : > { %v1695_v19 = vadd.f32 1.0, %v2827_v18 }
 0x97f   : > { %v1696_v20 = vmul.f32 %v1695_v19, %v1653_v4 }
 0x981   : > { %1713 = vmatmul.f32.vlgmr.msrb.gmra.mxu3 %v1696_v20  ;;  %v1747_v20 = vperm.slane %v3780_v7, 1 }
 0x9e1   : > { %v1826_v46 = vpop.xlane.xlu0 %1825 }
 0x9e2   : > { %v1830_v48 = vmul.f32 %v1826_v46, %v3615_v9  ;;  %v1751_v46 = vld [vmem:[%s4114_s9] sm:$0xff] }
 0x9e4   : > { %v1832_v53 = vadd.f32 1e-05, %v1830_v48 }
 0x9e6   : > { %3040 = vrsqrt.f32 %v1832_v53  ;;  %vm1840_vm7 = vweird.f32 %v1832_v53 }
 0x9ec   : > { %v3041_v57 = vpop.eup %3040 }
 0x9ed   : > { %v1835_v59 = vmul.f32 %v3041_v57, %v1832_v53  ;;  %vm1841_vm8 = vweird.f32 %v3041_v57 }
 0x9ee   : > { %vm1842_vm10 = vmor %vm1840_vm7, %vm1841_vm8 }
 0x9ef   : > { %v1836_v63 = vmul.f32 %v3041_v57, %v1835_v59 }
 0x9f1   : > { %v1837_v1 = vmul.f32 0.5, %v1836_v63 }
 0x9f3   : > { %v1838_v5 = vsub.f32 1.5, %v1837_v1 }
 0x9f5   : > { %v1839_v8 = vmul.f32 %v3041_v57, %v1838_v5 }
 0x9f7   : > { %v1843_v13 = vsel %vm1842_vm10, %v3041_v57, %v1839_v8 }
 0x9f8   : > { %v1854_v16 = vmul.f32 %v1843_v13, %v1820_v34 }
 0x9fa   : > { %v1857_v21 = vmul.f32 %v1856_v11, %v1854_v16 }
 0xa04   : > { %v1714_v25 = vpop.f32.mrf.mxu3 }
 0xa05   : > { %v1717_v26 = vadd.f32 %v1714_v25, %v3716_v62  ;;  %v1860_v25 = vadd.f32 %v1859_v17, %v1857_v21 }
 0xa07   : > { %v1719_v27 = vadd.f32 %v3010_v24, %v1717_v26  ;;  %2829 = vmatmul.msk.f32.vlgmr.msra.gmra.mxu0 %vm1093_vm1, %v1860_v25 }
 0xa09   : > { %v1720_v28 = vadd.f32 %v1719_v27, %v3625_v30 }
 0xa0b   : > { %v1723_v29 = vsel %vm1093_vm1, %v1720_v28, 0.0 }
 0xa0c   : > { %1724 = vadd.xlane.f32.xlu1 %v1723_v29 }
 0xa14   : > { %1816 = vadd.xlane.f32.xlu1 %v1815_v23 }
 0xa7f   : > { %v1725_v62 = vpop.xlane.xlu1 %1724 }
 0xa80   : > { %v1726_v30 = vmul.f32 %v1725_v62, %v3615_v9 }
 0xa82   : > { %v1727_v37 = vsub.f32 %v1720_v28, %v1726_v30  ;;  %v3011_v30 = vld [vmem:[%s4115_s21] ss:$0 sm:$0xff] }
 0xa84   : > { %v1728_v39 = vmul.f32 %v1727_v37, %v1727_v37 }
 0xa86   : > { %v1729_v40 = vsel %vm1093_vm1, %v1728_v39, 0.0  ;;  %v1912_v39 = vpop.f32.mrf.mxu0 }
 0xa87   : > { %1730 = vadd.xlane.f32.xlu2 %v1729_v40  ;;  %v1817_v41 = vpop.xlane.xlu1 %1816  ;;  %v3796_v40 = vadd.f32 %v3011_v30, %v1912_v39 }
 0xa88   : > { %v1819_v42 = vmul.f32 %v1817_v41, %v3615_v9 }
 0xa8a   : > { %v3766_v43 = vsub.f32 %v1750_v31, %v1819_v42 }
 0xa8c   : > { %v1823_v44 = vmul.f32 %v3766_v43, %v3766_v43 }
 0xa8e   : > { %v1827_v45 = vsel %vm1093_vm1, %v1823_v44, 0.0  ;;  %v1753_v44 = vld [vmem:[%s4114_s9 + $0x10] sm:$0xff] }
 0xa8f   : > { %1828 = vadd.xlane.f32.xlu1 %v1827_v45  ;;  %v1752_v45 = vld [vmem:[%s4114_s9 + $0x8] sm:$0xff] }
 0xaa8   : > { %2002 = vrot.lane.b32.xlu1 %v3796_v40, %s3258_s20 }
 0xafa   : > { %v1731_v49 = vpop.xlane.xlu2 %1730 }
 0xafb   : > { %v1732_v52 = vmul.f32 %v1731_v49, %v3615_v9 }
 0xafd   : > { %v1733_v55 = vadd.f32 1e-05, %v1732_v52 }
 0xaff   : > { %3042 = vrsqrt.f32 %v1733_v55  ;;  %vm1740_vm12 = vweird.f32 %v1733_v55 }
 0xb02   : > { %v1829_v56 = vpop.xlane.xlu1 %1828 }
 0xb03   : > { %v1831_v58 = vmul.f32 %v1829_v56, %v3615_v9 }
 0xb05   : > { %v3043_v60 = vpop.eup %3042  ;;  %v1833_v61 = vadd.f32 1e-05, %v1831_v58  ;;  %v1808_v58 = vperm.slane %v3780_v7, 2 }
 0xb06   : > { %v1735_v50 = vmul.f32 %v3043_v60, %v1733_v55  ;;  %vm1741_vm11 = vweird.f32 %v3043_v60 }
 0xb07   : > { %3044 = vrsqrt.f32 %v1833_v61  ;;  %vm1742_vm15 = vmor %vm1740_vm12, %vm1741_vm11  ;;  %vm1850_vm0 = vweird.f32 %v1833_v61 }
 0xb08   : > { %v1736_v0 = vmul.f32 %v3043_v60, %v1735_v50 }
 0xb0a   : > { %v1737_v2 = vmul.f32 0.5, %v1736_v0  ;;  %v1862_v0 = vperm.slane %v3780_v7, 4 }
 0xb0c   : > { %v1738_v6 = vsub.f32 1.5, %v1737_v2 }
 0xb0d   : > { %v3045_v10 = vpop.eup %3044 }
 0xb0e   : > { %v1739_v12 = vmul.f32 %v3043_v60, %v1738_v6  ;;  %v1845_v14 = vmul.f32 %v3045_v10, %v1833_v61  ;;  %vm1851_vm2 = vweird.f32 %v3045_v10  ;;  %v1810_v61 = vperm.slane %v3780_v7, 3 }
 0xb0f   : > { %vm1852_vm3 = vmor %vm1850_vm0, %vm1851_vm2 }
 0xb10   : > { %v1743_v18 = vsel %vm1742_vm15, %v3043_v60, %v1739_v12  ;;  %v1846_v4 = vmul.f32 %v3045_v10, %v1845_v14 }
 0xb11   : > { %v1744_v19 = vmul.f32 %v1743_v18, %v1727_v37 }
 0xb12   : > { %v1847_v22 = vmul.f32 0.5, %v1846_v4 }
 0xb13   : > { %v1746_v24 = vmul.f32 %v1745_v15, %v1744_v19 }
 0xb14   : > { %v1848_v26 = vsub.f32 1.5, %v1847_v22 }
 0xb15   : > { %v3784_v27 = vadd.f32 %v1747_v20, %v1746_v24 }
 0xb16   : > { %v1849_v28 = vmul.f32 %v3045_v10, %v1848_v26 }
 0xb17   : > { %v1786_v29 = vsel %vm1093_vm1, %v3784_v27, 0.0 }
 0xb18   : > { %1787 = vadd.xlane.f32.xlu2 %v1786_v29  ;;  %v1853_v31 = vsel %vm1852_vm3, %v3045_v10, %v1849_v28 }
 0xb19   : > { %v1855_v23 = vmul.f32 %v1853_v31, %v3766_v43  ;;  %v1754_v43 = vld [vmem:[%s4114_s9 + $0x18] sm:$0xff] }
 0xb1a   : > { %1878 = vmatpush.msrb.mxu2 %v1754_v43  ;;  %v2003_v53 = vpop.permute.xlu1 %2002 }
 0xb1b   : > { %v1858_v32 = vmul.f32 %v1856_v11, %v1855_v23 }
 0xb1c   : > { %1879 = vmatpush.msrb.mxu2 %v1753_v44 }
 0xb1d   : > { %v1861_v33 = vadd.f32 %v1859_v17, %v1858_v32 }
 0xb1e   : > { %1880 = vmatpush.msrb.mxu2 %v1752_v45 }
 0xb1f   : > { %2830 = vmatmul.msk.f32.gmra.mxu0 %vm1093_vm1, %v1861_v33 }
 0xb20   : > { %1881 = vmatpush.msrb.mxu2 %v1751_v46 }
 0xb8b   : > { %v1788_v34 = vpop.xlane.xlu2 %1787 }
 0xb8c   : > { %v1789_v35 = vmul.f32 %v1788_v34, %v3615_v9 }
 0xb8e   : > { %v1790_v36 = vsub.f32 %v3784_v27, %v1789_v35 }
 0xb90   : > { %v1791_v62 = vmul.f32 %v1790_v36, %v1790_v36 }
 0xb92   : > { %v1792_v37 = vsel %vm1093_vm1, %v1791_v62, 0.0 }
 0xb93   : > { %1793 = vadd.xlane.f32.xlu2 %v1792_v37 }
 0xb9c   : > { %v1915_v41 = vpop.f32.mrf.mxu0 }
 0xb9d   : > { %v1916_v42 = vadd.f32 %v3011_v30, %v1915_v41 }
 0xb9f   : > { %2004 = vrot.lane.b32.xlu0 %v1916_v42, %s3258_s20  ;;  %2831 = vmatpush.xpose.msk.msra.mxu1 %vm1248_vm9, %v1916_v42  ;;  %v3821_v8 = vpack.i.bf16 %v3796_v40, %v1916_v42 }
 0xba3   : > { %2832 = vmatpush.xpose.msk.msra.mxu1 %vm1248_vm9, %v3796_v40 }
 0xc06   : > { %v1794_v38 = vpop.xlane.xlu2 %1793 }
 0xc07   : > { %v1795_v47 = vmul.f32 %v1794_v38, %v3615_v9 }
 0xc09   : > { %v1796_v48 = vadd.f32 1e-05, %v1795_v47 }
 0xc0b   : > { %3046 = vrsqrt.f32 %v1796_v48  ;;  %vm1803_vm5 = vweird.f32 %v1796_v48 }
 0xc11   : > { %v3047_v49 = vpop.eup %3046  ;;  %v2005_v51 = vpop.permute.xlu0 %2004 }
 0xc12   : > { %v1798_v52 = vmul.f32 %v3047_v49, %v1796_v48  ;;  %2835 = vmatpush.xpose.msk.msrb.mxu1 %vm1248_vm9, %v2005_v51  ;;  %vm1804_vm4 = vweird.f32 %v3047_v49 }
 0xc13   : > { %vm1805_vm6 = vmor %vm1803_vm5, %vm1804_vm4 }
 0xc14   : > { %v1799_v54 = vmul.f32 %v3047_v49, %v1798_v52 }
 0xc16   : > { %v1800_v55 = vmul.f32 0.5, %v1799_v54  ;;  %2836 = vmatpush.xpose.msk.msrb.mxu1 %vm1248_vm9, %v2003_v53 }
 0xc18   : > { %v1801_v56 = vsub.f32 1.5, %v1800_v55 }
 0xc1a   : > { %v1802_v57 = vmul.f32 %v3047_v49, %v1801_v56 }
 0xc1c   : > { %v1806_v59 = vsel %vm1805_vm6, %v3047_v49, %v1802_v57 }
 0xc1d   : > { %v1807_v60 = vmul.f32 %v1806_v59, %v1790_v36 }
 0xc1f   : > { %v1809_v50 = vmul.f32 %v1808_v58, %v1807_v60 }
 0xc21   : > { %v1811_v63 = vadd.f32 %v1810_v61, %v1809_v50 }
 0xc23   : > { %2828 = vmatmul.msk.f32.vlgmr.msrb.gmra.mxu2 %vm1093_vm1, %v1811_v63 }
 0xca6   : > { %v1883_v1 = vpop.f32.mrf.mxu2 }
 0xca7   : > { %v1884_v2 = vadd.f32 %v1883_v1, %v1862_v0 }
 0xca9   : > { %2000 = vrot.lane.b32.xlu2 %v1884_v2, %s3258_s20  ;;  %2833 = vmatmul.msk.f32.vlgmr.msra.gmra.mxu1 %vm1248_vm9, %v1884_v2 }
 0xcb1   : > { %2174 = vrot.lane.b32.xlu2 %v1916_v42, %s3261_s2 }
 0xd03   : > { %v2001_v3 = vpop.permute.xlu2 %2000 }
 0xd04   : > { %2837 = vmatmul.msk.f32.vlgmr.msrb.gmra.mxu1 %vm1248_vm9, %v2001_v3 }
 0xd0b   : > { %v2175_v28 = vpop.permute.xlu2 %2174 }
 0xd26   : > { %v1944_v5 = vpop.f32.mrf.mxu1 }
 0xd27   : > { %v1947_v6 = vsel %vm1572_vm13, %v1944_v5, -inf }
 0xd28   : > { %1948 = vmax.xlane.f32.xlu0 %v1947_v6 }
 0xd3c   : > { %2994 = vrot.lane.b32.xlu0 %v3821_v8, %s3264_s28 }
 0xd44   : > { %2172 = vrot.lane.b32.xlu0 %v3796_v40, %s3261_s2 }
 0xd81   : > { %v2029_v10 = vpop.f32.mrf.mxu1 }
 0xd82   : > { %v2032_v11 = vsel %vm1572_vm13, %v2029_v10, -inf }
 0xd83   : > { %2033 = vmax.xlane.f32.xlu1 %v2032_v11 }
 0xd9b   : > { %v1949_v12 = vpop.xlane.xlu0 %1948 }
 0xd9c   : > { %v1950_v13 = vsub.f32 %v1944_v5, %v1949_v12  ;;  %2989 = vrot.lane.b32.xlu1 %v3821_v8, %s3259_s3 }
 0xd9e   : > { %v1951_v14 = vmul.f32 1.442695, %v1950_v13 }
 0xda0   : > { %3048 = vpow2.f32 %v1951_v14 }
 0xda4   : > { %2089 = vrot.lane.b32.xlu1 %v1916_v42, %s3260_s18 }
 0xda6   : > { %v3049_v15 = vpop.eup %3048 }
 0xda7   : > { %v1953_v16 = vsel %vm1572_vm13, %v3049_v15, 0.0 }
 0xda8   : > { %1954 = vadd.xlane.f32.xlu2 %v1953_v16 }
 0xdac   : > { %2085 = vrot.lane.b32.xlu1 %v1884_v2, %s3260_s18 }
 0xdae   : > { %v2995_v22 = vpop.permute.xlu0 %2994 }
 0xdaf   : > { %v2996_v26 = vunpack.i.l.bf16 %v2995_v22  ;;  %v2997_v29 = vunpack.i.h.bf16 %v2995_v22 }
 0xdc0   : > { %2170 = vrot.lane.b32.xlu2 %v1884_v2, %s3261_s2 }
 0xdf6   : > { %v2034_v17 = vpop.xlane.xlu1 %2033 }
 0xdf7   : > { %v2035_v18 = vsub.f32 %v2029_v10, %v2034_v17 }
 0xdf9   : > { %v2036_v4 = vmul.f32 1.442695, %v2035_v18 }
 0xdfb   : > { %3050 = vpow2.f32 %v2036_v4 }
 0xe01   : > { %v3051_v19 = vpop.eup %3050 }
 0xe02   : > { %v2038_v20 = vsel %vm1572_vm13, %v3051_v19, 0.0 }
 0xe03   : > { %2039 = vadd.xlane.f32.xlu0 %v2038_v20 }
 0xe0e   : > { %v2990_v21 = vpop.permute.xlu1 %2989 }
 0xe0f   : > { %v2991_v24 = vunpack.i.l.bf16 %v2990_v21  ;;  %v2992_v25 = vunpack.i.h.bf16 %v2990_v21 }
 0xe11   : > { %1994 = vmatpush.msra.mxu2 %v2991_v24 }
 0xe13   : > { %1995 = vmatpush.msra.mxu2 %v2992_v25 }
 0xe15   : > { %2079 = vmatpush.msrb.mxu2 %v2996_v26 }
 0xe16   : > { %v2090_v31 = vpop.permute.xlu1 %2089 }
 0xe17   : > { %2080 = vmatpush.msrb.mxu2 %v2997_v29  ;;  %2839 = vmatpush.xpose.msk.msrb.mxu0 %vm1248_vm9, %v2090_v31 }
 0xe18   : > { %2087 = vrot.lane.b32.xlu0 %v3796_v40, %s3260_s18  ;;  %v2173_v40 = vpop.permute.xlu0 %2172 }
 0xe1b   : > { %v1955_v23 = vpop.xlane.xlu2 %1954 }
 0xe1c   : > { %3052 = vrcp.f32 %v1955_v23  ;;  %v1967_v35 = vand.u32 2147483648, %v1955_v23  ;;  %v1965_v62 = vand.u32 2147483647, %v1955_v23  ;;  %vm1961_vm8 = vweird.f32 %v1955_v23 }
 0xe1e   : > { %v1968_v37 = vor.u32 1.1754944e-38, %v1967_v35  ;;  %vm1966_vm11 = vcmp.eq.f32.partialorder %v1965_v62, 8.507059e+37  ;;  %v2086_v56 = vpop.permute.xlu1 %2085 }
 0xe22   : > { %v3053_v32 = vpop.eup %3052 }
 0xe23   : > { %v1957_v33 = vmul.f32 %v3053_v32, %v1955_v23  ;;  %vm1962_vm7 = vweird.f32 %v3053_v32  ;;  %v2171_v57 = vpop.permute.xlu2 %2170 }
 0xe24   : > { %vm1963_vm10 = vmor %vm1961_vm8, %vm1962_vm7 }
 0xe25   : > { %v1958_v34 = vsub.f32 1.0, %v1957_v33 }
 0xe27   : > { %v1959_v36 = vmul.f32 %v3053_v32, %v1958_v34 }
 0xe29   : > { %v1960_v30 = vadd.f32 %v3053_v32, %v1959_v36 }
 0xe2b   : > { %v1964_v39 = vsel %vm1963_vm10, %v3053_v32, %v1960_v30 }
 0xe2c   : > { %v1969_v41 = vsel %vm1966_vm11, %v1968_v37, %v1964_v39 }
 0xe2d   : > { %v1970_v42 = vmul.f32 %v3049_v15, %v1969_v41 }
 0xe2f   : > { %2834 = vmatmul.msk.f32.vlgmr.msra.gmra.mxu2 %vm1572_vm13, %v1970_v42 }
 0xe30   : > { %2843 = vmatpush.xpose.msk.msra.mxu2 %vm1248_vm9, %v2175_v28 }
 0xe34   : > { %2844 = vmatpush.xpose.msk.msra.mxu2 %vm1248_vm9, %v2173_v40 }
 0xe76   : > { %v2040_v43 = vpop.xlane.xlu0 %2039 }
 0xe77   : > { %3054 = vrcp.f32 %v2040_v43  ;;  %v2052_v38 = vand.u32 2147483648, %v2040_v43  ;;  %v2050_v48 = vand.u32 2147483647, %v2040_v43  ;;  %vm2046_vm15 = vweird.f32 %v2040_v43 }
 0xe79   : > { %v2053_v51 = vor.u32 1.1754944e-38, %v2052_v38  ;;  %vm2051_vm2 = vcmp.eq.f32.partialorder %v2050_v48, 8.507059e+37  ;;  %v1761_v38 = vld [vmem:[%s4116_s10 + $0x8] sm:$0xff] }
 0xe7d   : > { %v3055_v44 = vpop.eup %3054 }
 0xe7e   : > { %v2042_v45 = vmul.f32 %v3055_v44, %v2040_v43  ;;  %vm2047_vm12 = vweird.f32 %v3055_v44 }
 0xe7f   : > { %vm2048_vm0 = vmor %vm2046_vm15, %vm2047_vm12 }
 0xe80   : > { %v2043_v46 = vsub.f32 1.0, %v2042_v45  ;;  %v1763_v45 = vld [vmem:[%s4116_s10 + $0x18] sm:$0xff] }
 0xe82   : > { %v2044_v47 = vmul.f32 %v3055_v44, %v2043_v46  ;;  %v1762_v46 = vld [vmem:[%s4116_s10 + $0x10] sm:$0xff] }
 0xe84   : > { %v2045_v49 = vadd.f32 %v3055_v44, %v2044_v47  ;;  %v1760_v47 = vld [vmem:[%s4116_s10] sm:$0xff] }
 0xe86   : > { %v2049_v52 = vsel %vm2048_vm0, %v3055_v44, %v2045_v49 }
 0xe87   : > { %v2054_v53 = vsel %vm2051_vm2, %v2053_v51, %v2049_v52 }
 0xe88   : > { %v2055_v54 = vmul.f32 %v3051_v19, %v2054_v53 }
 0xe8a   : > { %v2088_v55 = vpop.permute.xlu0 %2087  ;;  %2838 = vmatmul.msk.f32.vlgmr.msrb.gmra.mxu2 %vm1572_vm13, %v2055_v54 }
 0xe8b   : > { %2840 = vmatpush.xpose.msk.msrb.mxu0 %vm1248_vm9, %v2088_v55  ;;  %v2270_v55 = vperm.slane %v3780_v7, 5 }
 0xe8e   : > { %2841 = vmatmul.msk.f32.vlgmr.msrb.gmra.mxu0 %vm1248_vm9, %v2086_v56 }
 0xe92   : > { %2845 = vmatmul.msk.f32.vlgmr.msra.gmra.mxu2 %vm1248_vm9, %v2171_v57 }
 0xeb2   : > { %v3845_v58 = vpop.f32.mrf.mxu2 }
 0xf0b   : > { %v2114_v59 = vpop.f32.mrf.mxu0 }
 0xf0c   : > { %v2117_v60 = vsel %vm1572_vm13, %v2114_v59, -inf }
 0xf0d   : > { %2118 = vmax.xlane.f32.xlu2 %v2117_v60  ;;  %v2082_v61 = vpop.f32.mrf.mxu2 }
 0xf15   : > { %v2199_v50 = vpop.f32.mrf.mxu2 }
 0xf16   : > { %v2202_v63 = vsel %vm1572_vm13, %v2199_v50, -inf }
 0xf17   : > { %2203 = vmax.xlane.f32.xlu0 %v2202_v63 }
 0xf2b   : > { %2999 = vrot.lane.b32.xlu0 %v3821_v8, %s3263_s5 }
 0xf80   : > { %v2119_v0 = vpop.xlane.xlu2 %2118 }
 0xf81   : > { %v2120_v1 = vsub.f32 %v2114_v59, %v2119_v0 }
 0xf83   : > { %v2121_v2 = vmul.f32 1.442695, %v2120_v1  ;;  %v1767_v1 = vld [vmem:[%s3591_s24 + $0x18] sm:$0xff] }
 0xf84   : > { %2339 = vmatpush.msra.mxu3 %v1767_v1 }
 0xf85   : > { %3056 = vpow2.f32 %v2121_v2  ;;  %v1766_v2 = vld [vmem:[%s3591_s24 + $0x10] sm:$0xff] }
 0xf86   : > { %2340 = vmatpush.msra.mxu3 %v1766_v2 }
 0xf8a   : > { %v2204_v5 = vpop.xlane.xlu0 %2203 }
 0xf8b   : > { %v3057_v3 = vpop.eup %3056  ;;  %v2205_v6 = vsub.f32 %v2199_v50, %v2204_v5  ;;  %v1764_v5 = vld [vmem:[%s3591_s24] sm:$0xff] }
 0xf8c   : > { %v2123_v10 = vsel %vm1572_vm13, %v3057_v3, 0.0 }
 0xf8d   : > { %2124 = vadd.xlane.f32.xlu1 %v2123_v10  ;;  %v2206_v11 = vmul.f32 1.442695, %v2205_v6 }
 0xf8f   : > { %3058 = vpow2.f32 %v2206_v11 }
 0xf95   : > { %v3059_v12 = vpop.eup %3058 }
 0xf96   : > { %v2208_v13 = vsel %vm1572_vm13, %v3059_v12, 0.0 }
 0xf97   : > { %2209 = vadd.xlane.f32.xlu2 %v2208_v13 }
 0xf9d   : > { %v3000_v14 = vpop.permute.xlu0 %2999 }
 0xf9e   : > { %v3001_v15 = vunpack.i.l.bf16 %v3000_v14  ;;  %v3002_v16 = vunpack.i.h.bf16 %v3000_v14 }
 0xfa0   : > { %2164 = vmatpush.msra.mxu1 %v3001_v15 }
 0xfa2   : > { %2165 = vmatpush.msra.mxu1 %v3002_v16 }
 0xfa4   : > { %2286 = vmatpush.msrb.mxu1 %v1763_v45 }
 0xfa6   : > { %3004 = vrot.lane.b32.xlu1 %v3821_v8, %s3265_s26  ;;  %2287 = vmatpush.msrb.mxu1 %v1762_v46  ;;  %v1772_v46 = vld [vmem:[%s3600_s13 + $0x18] sm:$0xff]  ;;  %s4119_s26 = sld [smem:[#allocation54_spill]] (!%p2850_p10) }
 0xfa8   : > { %2288 = vmatpush.msrb.mxu1 %v1761_v38 }
 0xfaa   : > { %2289 = vmatpush.msrb.mxu1 %v1760_v47 }
 0xfaf   : > { %2256 = vrot.lane.b32.xlu2 %v2082_v61, %s3266_s19 }
0x1000   : > { %v2125_v17 = vpop.xlane.xlu1 %2124 }
0x1001   : > { %3060 = vrcp.f32 %v2125_v17  ;;  %v2137_v20 = vand.u32 2147483648, %v2125_v17  ;;  %v2135_v24 = vand.u32 2147483647, %v2125_v17  ;;  %vm2131_vm4 = vweird.f32 %v2125_v17 }
0x1003   : > { %v2138_v26 = vor.u32 1.1754944e-38, %v2137_v20  ;;  %vm2136_vm6 = vcmp.eq.f32.partialorder %v2135_v24, 8.507059e+37  ;;  %v1783_v24 = vld [vmem:[%s3600_s13 + $0x70] sm:$0xff] }
0x1007   : > { %v3061_v18 = vpop.eup %3060 }
0x1008   : > { %v2127_v4 = vmul.f32 %v3061_v18, %v2125_v17  ;;  %vm2132_vm3 = vweird.f32 %v3061_v18 }
0x1009   : > { %vm2133_vm5 = vmor %vm2131_vm4, %vm2132_vm3 }
0x100a   : > { %v2128_v19 = vsub.f32 1.0, %v2127_v4  ;;  %v2210_v21 = vpop.xlane.xlu2 %2209 }
0x100b   : > { %3062 = vrcp.f32 %v2210_v21  ;;  %v2222_v33 = vand.u32 2147483648, %v2210_v21  ;;  %v2220_v35 = vand.u32 2147483647, %v2210_v21  ;;  %vm2216_vm8 = vweird.f32 %v2210_v21 }
0x100c   : > { %v2129_v22 = vmul.f32 %v3061_v18, %v2128_v19  ;;  %v2319_v19 = vperm.slane %v3780_v7, 7 }
0x100d   : > { %v2223_v37 = vor.u32 1.1754944e-38, %v2222_v33  ;;  %vm2221_vm11 = vcmp.eq.f32.partialorder %v2220_v35, 8.507059e+37 }
0x100e   : > { %v2130_v25 = vadd.f32 %v3061_v18, %v2129_v22  ;;  %v1784_v22 = vld [vmem:[%s3600_s13 + $0x78] sm:$0xff] }
0x100f   : > { %2391 = vmatpush.msrb.mxu2 %v1784_v22 }
0x1010   : > { %v2134_v28 = vsel %vm2133_vm5, %v3061_v18, %v2130_v25  ;;  %v2317_v18 = vperm.slane %v3780_v7, 6  ;;  %v1782_v25 = vld [vmem:[%s3600_s13 + $0x68] sm:$0xff]  ;;  %v1781_v7 = vld [vmem:[%s3600_s13 + $0x60] sm:$0xff] }
0x1011   : > { %v2139_v8 = vsel %vm2136_vm6, %v2138_v26, %v2134_v28  ;;  %v3063_v29 = vpop.eup %3062  ;;  %2392 = vmatpush.msrb.mxu2 %v1783_v24  ;;  %v3012_v26 = vld [vmem:[%s1068_s29] ss:$0 sm:$0xff]  ;;  %v1780_v28 = vld [vmem:[%s3600_s13 + $0x58] sm:$0xff] }
0x1012   : > { %v2140_v31 = vmul.f32 %v3057_v3, %v2139_v8  ;;  %v2212_v23 = vmul.f32 %v3063_v29, %v2210_v21  ;;  %vm2217_vm7 = vweird.f32 %v3063_v29  ;;  %v2257_v49 = vpop.permute.xlu2 %2256  ;;  %v1765_v3 = vld [vmem:[%s3591_s24 + $0x8] sm:$0xff] }
0x1013   : > { %vm2218_vm10 = vmor %vm2216_vm8, %vm2217_vm7  ;;  %v2267_v51 = vsel %vm1248_vm9, %v3845_v58, %v2257_v49  ;;  %2341 = vmatpush.msra.mxu3 %v1765_v3  ;;  %2393 = vmatpush.msrb.mxu2 %v1782_v25 }
0x1014   : > { %2842 = vmatmul.msk.f32.vlgmr.msra.gmra.mxu1 %vm1572_vm13, %v2140_v31  ;;  %v2213_v32 = vsub.f32 1.0, %v2212_v23  ;;  %v1779_v31 = vld [vmem:[%s3600_s13 + $0x50] sm:$0xff] }
0x1015   : > { %2342 = vmatpush.msra.mxu3 %v1764_v5  ;;  %2394 = vmatpush.msrb.mxu2 %v1781_v7 }
0x1016   : > { %v2214_v34 = vmul.f32 %v3063_v29, %v2213_v32  ;;  %v1778_v32 = vld [vmem:[%s3600_s13 + $0x48] sm:$0xff] }
0x1017   : > { %2395 = vmatpush.msrb.mxu2 %v1780_v28 }
0x1018   : > { %v3005_v36 = vpop.permute.xlu1 %3004  ;;  %v2215_v62 = vadd.f32 %v3063_v29, %v2214_v34  ;;  %v1777_v34 = vld [vmem:[%s3600_s13 + $0x40] sm:$0xff] }
0x1019   : > { %v3006_v30 = vunpack.i.l.bf16 %v3005_v36  ;;  %v3007_v41 = vunpack.i.h.bf16 %v3005_v36  ;;  %2396 = vmatpush.msrb.mxu2 %v1779_v31  ;;  %v1776_v36 = vld [vmem:[%s3600_s13 + $0x38] sm:$0xff] }
0x101a   : > { %v2219_v39 = vsel %vm2218_vm10, %v3063_v29, %v2215_v62 }
0x101b   : > { %2249 = vmatpush.msra.mxu0 %v3006_v30  ;;  %v2224_v42 = vsel %vm2221_vm11, %v2223_v37, %v2219_v39  ;;  %2397 = vmatpush.msrb.mxu2 %v1778_v32  ;;  %v1775_v37 = vld [vmem:[%s3600_s13 + $0x30] sm:$0xff] }
0x101c   : > { %v2225_v40 = vmul.f32 %v3059_v12, %v2224_v42  ;;  %v1774_v42 = vld [vmem:[%s3600_s13 + $0x28] sm:$0xff] }
0x101d   : > { %2250 = vmatpush.msra.mxu0 %v3007_v41  ;;  %2398 = vmatpush.msrb.mxu2 %v1777_v34 }
0x101e   : > { %2846 = vmatmul.msk.f32.vlgmr.msra.gmra.mxu0 %vm1572_vm13, %v2225_v40 }
0x101f   : > { %2399 = vmatpush.msrb.mxu2 %v1776_v36 }
0x1021   : > { %2400 = vmatpush.msrb.mxu2 %v1775_v37 }
0x1023   : > { %2401 = vmatpush.msrb.mxu2 %v1774_v42 }
0x1091   : > { %v2167_v43 = vpop.f32.mrf.mxu1 }
0x1092   : > { %2260 = vrot.lane.b32.xlu0 %v2167_v43, %s3267_s6 }
0x109b   : > { %v2252_v44 = vpop.f32.mrf.mxu0 }
0x109c   : > { %2264 = vrot.lane.b32.xlu0 %v2252_v44, %s3268_s30  ;;  %v1773_v44 = vld [vmem:[%s3600_s13 + $0x20] sm:$0xff] }
0x109d   : > { %2402 = vmatpush.msrb.mxu2 %v1773_v44 }
0x109f   : > { %2403 = vmatpush.msrb.mxu2 %v1772_v46 }
0x1104   : > { %v2261_v48 = vpop.permute.xlu0 %2260 }
0x1105   : > { %v2268_v52 = vsel %vm1572_vm13, %v2267_v51, %v2261_v48  ;;  %v1771_v48 = vld [vmem:[%s3600_s13 + $0x10] sm:$0xff]  ;;  %v1770_v51 = vld [vmem:[%s3600_s13 + $0x8] sm:$0xff] }
0x1106   : > { %2404 = vmatpush.msrb.mxu2 %v1771_v48 }
0x1108   : > { %2405 = vmatpush.msrb.mxu2 %v1770_v51 }
0x110e   : > { %v2265_v53 = vpop.permute.xlu0 %2264 }
0x110f   : > { %v2269_v54 = vsel %vm1574_vm14, %v2268_v52, %v2265_v53  ;;  %v1769_v53 = vld [vmem:[%s3600_s13] sm:$0xff] }
0x1110   : > { %2847 = vmatmul.msk.f32.vlgmr.msrb.gmra.mxu1 %vm1093_vm1, %v2269_v54  ;;  %2406 = vmatpush.msrb.mxu2 %v1769_v53 }
0x118d   : > { %v2291_v56 = vpop.f32.mrf.mxu1 }
0x118e   : > { %v2292_v57 = vadd.f32 %v2291_v56, %v2270_v55 }
0x1190   : > { %v3871_v59 = vadd.f32 %v2292_v57, %v3784_v27 }
0x1192   : > { %v2295_v58 = vsel %vm1093_vm1, %v3871_v59, 0.0 }
0x1193   : > { %2296 = vadd.xlane.f32.xlu2 %v2295_v58 }
0x1206   : > { %v2297_v60 = vpop.xlane.xlu2 %2296 }
0x1207   : > { %v2298_v61 = vmul.f32 %v2297_v60, %v3615_v9 }
0x1209   : > { %v2299_v50 = vsub.f32 %v3871_v59, %v2298_v61 }
0x120b   : > { %v2300_v63 = vmul.f32 %v2299_v50, %v2299_v50 }
0x120d   : > { %v2301_v0 = vsel %vm1093_vm1, %v2300_v63, 0.0 }
0x120e   : > { %2302 = vadd.xlane.f32.xlu1 %v2301_v0 }
0x1281   : > { %v2303_v6 = vpop.xlane.xlu1 %2302 }
0x1282   : > { %v2304_v10 = vmul.f32 %v2303_v6, %v3615_v9 }
0x1284   : > { %v2305_v11 = vadd.f32 1e-05, %v2304_v10 }
0x1286   : > { %3064 = vrsqrt.f32 %v2305_v11  ;;  %vm2312_vm13 = vweird.f32 %v2305_v11 }
0x128c   : > { %v3065_v12 = vpop.eup %3064 }
0x128d   : > { %v2307_v13 = vmul.f32 %v3065_v12, %v2305_v11  ;;  %vm2313_vm9 = vweird.f32 %v3065_v12 }
0x128e   : > { %vm2314_vm14 = vmor %vm2312_vm13, %vm2313_vm9 }
0x128f   : > { %v2308_v14 = vmul.f32 %v3065_v12, %v2307_v13 }
0x1291   : > { %v2309_v15 = vmul.f32 0.5, %v2308_v14 }
0x1293   : > { %v2310_v16 = vsub.f32 1.5, %v2309_v15 }
0x1295   : > { %v2311_v17 = vmul.f32 %v3065_v12, %v2310_v16 }
0x1297   : > { %v2315_v9 = vsel %vm2314_vm14, %v3065_v12, %v2311_v17 }
0x1298   : > { %v2316_v4 = vmul.f32 %v2315_v9, %v2299_v50 }
0x129a   : > { %v2318_v20 = vmul.f32 %v2317_v18, %v2316_v4  ;;  %v3013_v4 = vld [vmem:[%s3605_s8 + $0x8] ss:$0 sm:$0xff] }
0x129c   : > { %v2320_v21 = vadd.f32 %v2319_v19, %v2318_v20 }
0x129e   : > { %2848 = vmatmul.msk.f32.vlgmr.msra.gmra.mxu3 %vm1093_vm1, %v2320_v21 }
0x1321   : > { %v2344_v8 = vpop.f32.mrf.mxu3 }
0x1322   : > { %v3896_v29 = vadd.f32 %v3012_v26, %v2344_v8 }
0x1324   : > { %v2348_v23 = vmul.f32 0.70710677, %v3896_v29  ;;  %v2347_v17 = vmul.f32 0.5, %v3896_v29 }
0x1326   : > { %v2349_v33 = vmul.f32 %v2348_v23, %v2348_v23 }
0x1328   : > { %v2350_v35 = vmin.f32 %v2349_v33, 16.0 }
0x132a   : > { %v2351_v62 = vmul.f32 2.1237322e-06, %v2350_v35  ;;  %v2362_v30 = vmul.f32 3.8918573e-05, %v2350_v35 }
0x132c   : > { %v2352_v39 = vadd.f32 0.00028619796, %v2351_v62  ;;  %v2363_v41 = vadd.f32 0.001143296, %v2362_v30 }
0x132e   : > { %v2353_v40 = vmul.f32 %v2352_v39, %v2350_v35  ;;  %v2364_v43 = vmul.f32 %v2363_v41, %v2350_v35 }
0x1330   : > { %v2365_v45 = vadd.f32 0.014752088, %v2364_v43  ;;  %v2354_v38 = vadd.f32 0.0036580483, %v2353_v40 }
0x1332   : > { %v2366_v47 = vmul.f32 %v2365_v45, %v2350_v35  ;;  %v2355_v52 = vmul.f32 %v2354_v38, %v2350_v35 }
0x1334   : > { %v2367_v49 = vadd.f32 0.112945676, %v2366_v47  ;;  %v2356_v56 = vadd.f32 0.05243302, %v2355_v52 }
0x1336   : > { %v2368_v54 = vmul.f32 %v2367_v49, %v2350_v35  ;;  %v2357_v60 = vmul.f32 %v2356_v56, %v2350_v35 }
0x1338   : > { %v2369_v55 = vadd.f32 0.4994258, %v2368_v54  ;;  %v2358_v61 = vadd.f32 0.18741608, %v2357_v60 }
0x133a   : > { %v2370_v57 = vmul.f32 %v2369_v55, %v2350_v35  ;;  %v2359_v63 = vmul.f32 %v2358_v61, %v2350_v35 }
0x133c   : > { %v2371_v58 = vadd.f32 1.0, %v2370_v57  ;;  %v2360_v3 = vadd.f32 1.1283791, %v2359_v63 }
0x133e   : > { %3066 = vrcp.f32 %v2371_v58  ;;  %v2383_v2 = vand.u32 2147483648, %v2371_v58  ;;  %v2381_v6 = vand.u32 2147483647, %v2371_v58  ;;  %vm2377_vm15 = vweird.f32 %v2371_v58 }
0x133f   : > { %v2361_v12 = vmul.f32 %v2360_v3, %v2348_v23 }
0x1340   : > { %v2384_v11 = vor.u32 1.1754944e-38, %v2383_v2  ;;  %vm2382_vm2 = vcmp.eq.f32.partialorder %v2381_v6, 8.507059e+37 }
0x1344   : > { %v3067_v50 = vpop.eup %3066 }
0x1345   : > { %v2373_v0 = vmul.f32 %v3067_v50, %v2371_v58  ;;  %vm2378_vm12 = vweird.f32 %v3067_v50 }
0x1346   : > { %vm2379_vm0 = vmor %vm2377_vm15, %vm2378_vm12 }
0x1347   : > { %v2374_v1 = vsub.f32 1.0, %v2373_v0 }
0x1349   : > { %v2375_v5 = vmul.f32 %v3067_v50, %v2374_v1 }
0x134b   : > { %v2376_v10 = vadd.f32 %v3067_v50, %v2375_v5 }
0x134d   : > { %v2380_v13 = vsel %vm2379_vm0, %v3067_v50, %v2376_v10 }
0x134e   : > { %v2385_v14 = vsel %vm2382_vm2, %v2384_v11, %v2380_v13 }
0x134f   : > { %v2386_v15 = vmul.f32 %v2385_v14, %v2361_v12 }
0x1351   : > { %v2849_v16 = vclamps-f32 %v2386_v15, 1.0 }
0x1353   : > { %v2389_v18 = vadd.f32 1.0, %v2849_v16 }
0x1355   : > { %v2390_v9 = vmul.f32 %v2389_v18, %v2347_v17 }
0x1357   : > { %2407 = vmatmul.f32.vlgmr.msrb.gmra.mxu2 %v2390_v9 }
0x13da   : > { %v2408_v19 = vpop.f32.mrf.mxu2 }
0x13db   : > { %v2411_v20 = vadd.f32 %v2408_v19, %v3871_v59 }
0x13dd   : > { %v2413_v21 = vadd.f32 %v3013_v4, %v2411_v20  ;;  %2419 = sbr.rel (%p2850_p10) target bundleno = 5227 (0x146b), region = 124 }
0x13df   : > { %v2414_v22 = vadd.f32 %v2413_v21, %v3784_v27 }
0x13e1   : > { %2415 = vst.msk [vmem:[#allocation2] sm:$0xff] %vm1093_vm1, %v2414_v22 }
0x13e2   : > { %v2424_v24 = vld [vmem:[%s4118_s12 + $0x18] sm:$0xff]  ;;  %v2423_v25 = vld [vmem:[%s4118_s12 + $0x10] sm:$0xff]  ;;  %v2422_v59 = vld [vmem:[%s4118_s12 + $0x8] sm:$0xff]  ;;  %v2420_v26 = vmax.f32 %v2414_v22, 0.0 }
0x13e3   : > { %2444 = vmatpush.msra.mxu0 %v2424_v24  ;;  %v2421_v27 = vld [vmem:[%s4118_s12] sm:$0xff] }
0x13e4   : > { %v3068_v7 = vld [vmem:[%s4119_s26] ss:$0 sm:$0xff] }
0x13e5   : > { %2445 = vmatpush.msra.mxu0 %v2423_v25 }
0x13e7   : > { %2446 = vmatpush.msra.mxu0 %v2422_v59 }
0x13e9   : > { %2447 = vmatpush.msra.mxu0 %v2421_v27 }
0x13ea   : > { %2851 = vmatmul.msk.f32.vlgmr.msra.gmra.mxu0 %vm1093_vm1, %v2420_v26 }
0x1467   : > { %v2449_v28 = vpop.f32.mrf.mxu0 }
0x1468   : > { %v2450_v8 = vadd.f32 %v3068_v7, %v2449_v28 }
0x146a   : > { %2452 = vst [vmem:[%s999_s4] sm:$0xff] %v2450_v8 }
0x146b PF: > { %s4120_s19 = sld [smem:[#allocation18_spill]]  ;;  %s2466_s9 = sshll.u32 %s999_s4, 4  ;;  %s2467_s9 = int_to_ptr.vmem [resolvable:$true] %s2466_s9 }
0x146c   : > { %s4121_s6 = sld [smem:[#allocation13_spill]] }
0x146d   : > { %s4123_s1 = sld [smem:[#allocation55_spill]] }
0x1471   : > { %s2853_s0 = sshll.u32 %s4120_s19, 3 }
0x1472   : > { %s4125_s10 = sand.u32 1, %s4121_s6  }
0x1473   : > { %s4124_s17 = smov %s4123_s1  ;;  %s2464_s23 = scalar_lea.hbm %s4123_s1, %s2853_s0 }
0x1474   : > { %s2468_s21 = sshll.u32 %s2464_s23, 4  ;;  %s2454_s24 = scalar_lea.sflag [#allocation5], %s4125_s10  ;;  %s2469_s21 = int_to_ptr.hbm [resolvable:$true] %s2468_s21 }
0x1475   : > { %s3143_s11 = sshra.s32 %s2469_s21, 4  ;;  %s3149_s14 = scalar_lea.hbm %s4124_s17, 16  ;;  %s3144_s11 = int_to_ptr.hbm [resolvable:$true] %s3143_s11 }
0x1476   : > { %s3145_s22 = scalar_lea.hbm %s3144_s11, 8  ;;  %p3150_p1 = scmp.lt.s32.totalorder %s3144_s11, %s4124_s17 }
0x1477   : > { %p3146_p11 = scmp.ne.s32.totalorder %s3144_s11, %s3145_s22  ;;  %p3151_p4 = scmp.lt.s32.totalorder %s3149_s14, %s3145_s22 }
0x1479   : > { %p3147_p13 = pnand %p3146_p11, %p3472_p12  ;;  %p3152_p5 = por %p3151_p4, %p3150_p1 }
0x147b   : > { %p3148_p0 = pneg %p3147_p13 }
0x147d   : > { %p3153_p6 = pnand %p3152_p5, %p3148_p0 }
0x147f   : > { %3156 = shalt.err (!%p3153_p6)
}
0x1480   : > { %2873 = dma.vmem_to_hbm [thread:$0]  (%p3472_p12), %s2467_s9, 128, %s2469_s21, %s2454_s24  }
0x1481 PF: > { %s4126_s27 = sld [smem:[#allocation21_spill]] }
0x1482   : > { %s4127_s4 = sld [smem:[#allocation12_spill]] }
0x1487   : > { %p2887_p7 = scmp.ge.s32.totalorder %s4126_s27, 2 }
0x1488   : > { %s2480_s18 = sand.u32 1, %s4127_s4  }
0x1489   : > { %p2883_p3 = pnand %p2887_p7, %p3480_p2  ;;  %s2481_s2 = scalar_lea.sflag [#allocation5], %s2480_s18 }
0x148b   : > { %p2884_p9 = pneg %p2883_p3 }
0x148d   : > { %3210 = dma.done.wait (%p2884_p9), %s2481_s2, 128  }
0x148e   : > { %3212 = vsyncadd (%p2884_p9), %s2481_s2, 4294967168  ;;  %s41_s6 = sadd.s32 1, %s4126_s27   ;;  %s4129_s3 = sld [smem:[#allocation13_spill]] }
0x148f   : > { %p38_p8 = scmp.ge.s32.totalorder %s41_s6, 6   ;;  %s4130_s28 = sld [smem:[#allocation14_spill]] }
0x1490   : > { %s4131_s29 = sld [smem:[#allocation25_spill]] }
0x1491   : > { %s4132_s30 = sld [smem:[#allocation15_spill]] }
0x1492   : > { %s4133_s4 = sld [smem:[#allocation16_spill]] }
0x1493   : > { %s4134_s0 = sld [smem:[#allocation24_spill]]  ;;  %40 = sbr.rel (!%p38_p8) target bundleno = 33 (0x21), region = 228 }
0x1494   : > { %s4135_s23 = sld [smem:[#allocation19_spill]] }
0x1495   : > { %s4136_s1 = sld [smem:[#allocation20_spill]] }
0x1496   : > { %s4137_s5 = sld [smem:[#allocation22_spill]] }
0x1497   : > { %s4138_s24 = sld [smem:[#allocation23_spill]] }
0x1498   :  { %2487 = vsyncpa [#allocation4], 1 }
0x1499   :  { %2489 = vsyncpa [#allocation4 + $0x1], 1 }
0x149a   :  { %2490 = vsyncpa [#allocation7], 1 }
0x149b   :  { %2492 = vsyncpa [#allocation7 + $0x1], 1 }
0x149c   :  { %2493 = vsyncpa [#allocation5], 1 }
0x149d   :  { %2495 = vsyncpa [#allocation5 + $0x1], 1 }

</bundles_post_ra>
